<compile_context>
chip_gen: v7x
topology: tpu7x:2x2x1
jax: 0.10.0
libtpu: 0.0.40
codegen_flags: <defaults>
</compile_context>

<pallas_src>
import math

import jax
import jax.numpy as jnp
from jax.experimental import pallas as pl
from jax.experimental.pallas import tpu as pltpu

# ----------------------------- tiny BERT config -----------------------------
VOCAB = 128
TYPE_VOCAB = 2
MAX_POS = 64
BATCH = 2            # matches the module's internal batch_size = 2
SEQ = 8
HIDDEN = 32
NUM_HEADS = 4
HEAD_DIM = HIDDEN // NUM_HEADS
INTER = 64
NUM_LAYERS = 2
EPS = 1e-12          # BERT LayerNorm eps


# ----------------------------- shared math helpers ---------------------------
def _layernorm(x, gamma, beta):
    mu = jnp.mean(x, axis=-1, keepdims=True)
    var = jnp.mean((x - mu) ** 2, axis=-1, keepdims=True)
    return (x - mu) * jax.lax.rsqrt(var + EPS) * gamma + beta


def _gelu(x):
    # tanh approximation of GELU (EUP-friendly on TPU).
    c = math.sqrt(2.0 / math.pi)
    return 0.5 * x * (1.0 + jnp.tanh(c * (x + 0.044715 * x * x * x)))


# ----------------------------- fused Pallas kernel ---------------------------
def fused_bert_kernel(emb_ref, mask_ref, gvec_ref,
                      wqkvo_ref, wi_ref, w2_ref, vecs_ref, pool_w_ref,
                      out_ref, ctx_ref):
    """Whole BERT forward in one kernel.

    emb_ref   : (B*S, H)   summed word+pos+type embeddings (f32)
    mask_ref  : (B*S, B*S) additive block-diagonal attention mask (0 / -10000)
    gvec_ref  : (3, H)     rows = [emb-LN gamma, emb-LN beta, pooler bias]
    wqkvo_ref : (L, H, 4H) bf16, lanes = [Wq | Wk | Wv | Wo]
    wi_ref    : (L, H, INTER) bf16
    w2_ref    : (L, INTER, H) bf16
    vecs_ref  : (L, 8, 3H) f32, rows = [bq|bk|bv, bo, bi, b2, g1, b1, g2, b2ln] (zero-padded)
    pool_w_ref: (H, H)     bf16 pooler weight
    out_ref   : (B*S, H)   tanh-pooled slab (wrapper selects the CLS rows)
    ctx_ref   : VMEM scratch (B*S, H) for per-head attention context
    """
    H, H3 = HIDDEN, 3 * HIDDEN

    eg = gvec_ref[0:1, :]
    eb = gvec_ref[1:2, :]
    pb = gvec_ref[2:3, :]

    # Embedding LayerNorm; mask loaded once (already broadcast, no per-head re-broadcast).
    x = _layernorm(emb_ref[...], eg, eb)                                # (B*S, H)
    mask = mask_ref[...]                                                # (B*S, B*S)
    scale = 1.0 / math.sqrt(HEAD_DIM)

    # Static unroll over layers; all weights resident in VMEM the whole time.
    for l in range(NUM_LAYERS):
        w_all = wqkvo_ref[l].astype(jnp.float32)                        # (H, 4H)
        vec = vecs_ref[l]                                               # (8, 3H)
        bqkv = vec[0:1, :]                                              # (1, 3H)
        bo = vec[1:2, 0:H]
        bi = vec[2:3, 0:INTER]
        b2 = vec[3:4, 0:H]
        g1 = vec[4:5, 0:H]
        b1 = vec[5:6, 0:H]
        g2 = vec[6:7, 0:H]
        b2ln = vec[7:8, 0:H]

        # Fused Q/K/V projection over all B*S rows: one MXU push + one bias add.
        qkv = jnp.dot(x, w_all[:, :H3], preferred_element_type=jnp.float32) + bqkv

        # Per-head attention over the full (B*S) slab; block-diagonal mask handles both padding
        # and cross-batch blocking.  Results go straight into the ctx scratch slice.
        for h in range(NUM_HEADS):
            c0 = h * HEAD_DIM
            qh = qkv[:, c0:c0 + HEAD_DIM]
            kh = qkv[:, H + c0:H + c0 + HEAD_DIM]
            vh = qkv[:, 2 * H + c0:2 * H + c0 + HEAD_DIM]
            # contracting-dim dot_general: MXU consumes K directly, no XLU transpose.
            s = jax.lax.dot_general(qh, kh, (((1,), (1,)), ((), ())),
                                    preferred_element_type=jnp.float32) * scale + mask
            s = s - jnp.max(s, axis=-1, keepdims=True)
            p = jnp.exp(s)
            p = p * pl.reciprocal(jnp.sum(p, axis=-1, keepdims=True), approx=True)
            ctx_ref[:, c0:c0 + HEAD_DIM] = jnp.dot(p, vh,
                                                   preferred_element_type=jnp.float32)

        attn = jnp.dot(ctx_ref[...], w_all[:, H3:],
                       preferred_element_type=jnp.float32) + bo
        h1 = _layernorm(x + attn, g1, b1)
        inter = _gelu(jnp.dot(h1, wi_ref[l].astype(jnp.float32),
                              preferred_element_type=jnp.float32) + bi)
        ffn = jnp.dot(inter, w2_ref[l].astype(jnp.float32),
                      preferred_element_type=jnp.float32) + b2
        x = _layernorm(h1 + ffn, g2, b2ln)

    # Pooler over ALL rows (extra rows are free under the MXU min tile, no CLS concatenate);
    # the wrapper slices out rows {0, SEQ, ...}.
    out_ref[...] = jnp.tanh(
        jnp.dot(x, pool_w_ref[...].astype(jnp.float32),
                preferred_element_type=jnp.float32) + pb)


# ----------------------------- one-time operand packing ----------------------
def prepare_packed(params):
    """Pack per-layer weights/biases ONCE (outside jit, off the launch critical path)."""
    wqkvo, wi, w2, vecs = [], [], [], []

    def pad_row(v):  # (1, d) -> (1, 3H)
        return jnp.pad(v, ((0, 0), (0, 3 * HIDDEN - v.shape[1])))

    for (wq, bq, wk, bk, wv, bv, wo, bo, g1, b1, wi_, bi_, w2_, b2_, g2, b2ln) in params["layers"]:
        wqkvo.append(jnp.concatenate([wq, wk, wv, wo], axis=1))         # (H, 4H)
        wi.append(wi_)
        w2.append(w2_)
        vecs.append(jnp.concatenate(
            [jnp.concatenate([bq, bk, bv], axis=1),                     # (1, 3H)
             pad_row(bo), pad_row(bi_), pad_row(b2_),
             pad_row(g1), pad_row(b1), pad_row(g2), pad_row(b2ln)], axis=0))  # (8, 3H)

    return {
        "word_emb": params["word_emb"],
        "pos_emb": params["pos_emb"],
        "type_emb": params["type_emb"],
        "gvec": jnp.concatenate([params["emb_ln_g"], params["emb_ln_b"],
                                 params["pool_b"]], axis=0),            # (3, H) f32
        "wqkvo": jnp.stack(wqkvo).astype(jnp.bfloat16),                 # (L, H, 4H) bf16
        "wi": jnp.stack(wi).astype(jnp.bfloat16),                       # (L, H, INTER) bf16
        "w2": jnp.stack(w2).astype(jnp.bfloat16),                       # (L, INTER, H) bf16
        "vecs": jnp.stack(vecs),                                        # (L, 8, 3H) f32
        "pool_w": params["pool_w"].astype(jnp.bfloat16),                # (H, H) bf16
    }


# ----------------------------- forward (jit'ed) -------------------------------
@jax.jit
def bert_embedder_forward(input_ids, attention_mask, token_type_ids, packed):
    # Embedding gathers are JAX glue (fused by XLA under jit); everything else
    # runs inside a single fused pallas_call.
    pos_ids = jnp.arange(SEQ)[None, :]
    emb = (packed["word_emb"][input_ids]
           + packed["pos_emb"][pos_ids]
           + packed["type_emb"][token_type_ids]).reshape(BATCH * SEQ, HIDDEN)

    # Block-diagonal additive mask over the fused (B*S, B*S) score matrix:
    # HF-style -10000 on padded keys, and -10000 on cross-batch pairs.
    key_mask = (1.0 - attention_mask.astype(jnp.float32)) * -10000.0    # (B, S)
    eye = jnp.eye(BATCH, dtype=jnp.float32)
    mask_full = jnp.broadcast_to(
        eye[:, None, :, None] * (key_mask[None, None, :, :] + 10000.0) - 10000.0,
        (BATCH, SEQ, BATCH, SEQ)).reshape(BATCH * SEQ, BATCH * SEQ)

    pooled_all = pl.pallas_call(
        fused_bert_kernel,
        out_shape=jax.ShapeDtypeStruct((BATCH * SEQ, HIDDEN), jnp.float32),
        scratch_shapes=[pltpu.VMEM((BATCH * SEQ, HIDDEN), jnp.float32)],
    )(emb, mask_full, packed["gvec"], packed["wqkvo"], packed["wi"],
      packed["w2"], packed["vecs"], packed["pool_w"])

    # CLS row of each batch element.
    return pooled_all[::SEQ, :]


# ----------------------------- pure-JAX reference -----------------------------
def reference_forward(input_ids, attention_mask, token_type_ids, params):
    pos_ids = jnp.arange(SEQ)[None, :]
    emb = (params["word_emb"][input_ids]
           + params["pos_emb"][pos_ids]
           + params["type_emb"][token_type_ids])
    x = _layernorm(emb, params["emb_ln_g"], params["emb_ln_b"])
    add_mask = (1.0 - attention_mask.astype(jnp.float32))[:, None, None, :] * -10000.0
    for (wq, bq, wk, bk, wv, bv, wo, bo, g1, b1, wi, bi, w2, b2, g2, b2ln) in params["layers"]:
        q, k, v = x @ wq + bq, x @ wk + bk, x @ wv + bv

        def split(t):
            return t.reshape(BATCH, SEQ, NUM_HEADS, HEAD_DIM).transpose(0, 2, 1, 3)

        qh, kh, vh = split(q), split(k), split(v)
        s = jnp.einsum("bnqd,bnkd->bnqk", qh, kh) / math.sqrt(HEAD_DIM) + add_mask
        p = jax.nn.softmax(s, axis=-1)
        ctx = jnp.einsum("bnqk,bnkd->bnqd", p, vh).transpose(0, 2, 1, 3).reshape(BATCH, SEQ, HIDDEN)
        h1 = _layernorm(x + ctx @ wo + bo, g1, b1)
        x = _layernorm(h1 + _gelu(h1 @ wi + bi) @ w2 + b2, g2, b2ln)
    return jnp.tanh(x[:, 0, :] @ params["pool_w"] + params["pool_b"])


# ----------------------------- deterministic init -----------------------------
def init_params(key):
    def dense(k, din, dout):
        k1, k2 = jax.random.split(k)
        # Weight matrices are bf16-rounded at init: the kernel DMAs them as bf16, the f32
        # reference uses the identical (bf16-representable) values -> bit-matched weights.
        w = jax.random.normal(k1, (din, dout), jnp.float32) * 0.02
        w = w.astype(jnp.bfloat16).astype(jnp.float32)
        b = jax.random.normal(k2, (1, dout), jnp.float32) * 0.02
        return w, b

    keys = jax.random.split(key, 8 + NUM_LAYERS)
    params = {
        "word_emb": jax.random.normal(keys[0], (VOCAB, HIDDEN), jnp.float32) * 0.02,
        "pos_emb":  jax.random.normal(keys[1], (MAX_POS, HIDDEN), jnp.float32) * 0.02,
        "type_emb": jax.random.normal(keys[2], (TYPE_VOCAB, HIDDEN), jnp.float32) * 0.02,
        "emb_ln_g": jnp.ones((1, HIDDEN), jnp.float32),
        "emb_ln_b": jnp.zeros((1, HIDDEN), jnp.float32),
    }
    params["pool_w"], params["pool_b"] = dense(keys[3], HIDDEN, HIDDEN)

    layers = []
    for i in range(NUM_LAYERS):
        lk = jax.random.split(keys[8 + i], 6)
        wq, bq = dense(lk[0], HIDDEN, HIDDEN)
        wk, bk = dense(lk[1], HIDDEN, HIDDEN)
        wv, bv = dense(lk[2], HIDDEN, HIDDEN)
        wo, bo = dense(lk[3], HIDDEN, HIDDEN)
        g1, b1 = jnp.ones((1, HIDDEN), jnp.float32), jnp.zeros((1, HIDDEN), jnp.float32)
        wi, bi = dense(lk[4], HIDDEN, INTER)
        w2, b2 = dense(lk[5], INTER, HIDDEN)
        g2, b2ln = jnp.ones((1, HIDDEN), jnp.float32), jnp.zeros((1, HIDDEN), jnp.float32)
        layers.append((wq, bq, wk, bk, wv, bv, wo, bo, g1, b1, wi, bi, w2, b2, g2, b2ln))
    params["layers"] = layers
    return params


# ----------------------------- main -------------------------------------------
if __name__ == "__main__":
    key = jax.random.PRNGKey(0)
    kp, kid, ktt = jax.random.split(key, 3)

    params = init_params(kp)
    packed = prepare_packed(params)   # one-time packing, outside the jitted forward

    # Synthetic "tokenized" batch (the real module pads to the longest sentence).
    input_ids = jax.random.randint(kid, (BATCH, SEQ), 1, VOCAB, dtype=jnp.int32)
    token_type_ids = jax.random.randint(ktt, (BATCH, SEQ), 0, TYPE_VOCAB, dtype=jnp.int32)
    # second sequence padded (last 3 positions are PAD)
    attention_mask = jnp.array([[1] * SEQ, [1] * (SEQ - 3) + [0] * 3], dtype=jnp.int32)
    input_ids = input_ids * attention_mask            # pad ids -> 0
    token_type_ids = token_type_ids * attention_mask  # pad type ids -> 0

    pooled = bert_embedder_forward(input_ids, attention_mask, token_type_ids, packed)
    pooled = jax.block_until_ready(pooled)

    ref = reference_forward(input_ids, attention_mask, token_type_ids, params)
    assert pooled.shape == (BATCH, HIDDEN)
    assert jnp.allclose(pooled, ref, rtol=1e-3, atol=1e-3), "mismatch vs pure-JAX reference"

    print("KERNEL_OK")
</pallas_src>

<mosaic_0001>
module attributes {stable_mosaic.version = 11 : i64} {
  func.func @fused_bert_kernel(%arg0: memref<16x32xf32, #tpu.memory_space<vmem>>, %arg1: memref<16x16xf32, #tpu.memory_space<vmem>>, %arg2: memref<3x32xf32, #tpu.memory_space<vmem>>, %arg3: memref<2x32x128xbf16, #tpu.memory_space<vmem>>, %arg4: memref<2x32x64xbf16, #tpu.memory_space<vmem>>, %arg5: memref<2x64x32xbf16, #tpu.memory_space<vmem>>, %arg6: memref<2x8x96xf32, #tpu.memory_space<vmem>>, %arg7: memref<32x32xbf16, #tpu.memory_space<vmem>>, %arg8: memref<16x32xf32, #tpu.memory_space<vmem>>, %arg9: memref<16x32xf32, #tpu.memory_space<vmem>>) attributes {dimension_semantics = [], scalar_prefetch = 0 : i64, scratch_operands = 1 : i64, tpu.core_type = #tpu.core_type<tc>} {
    %c0 = arith.constant 0 : index
    %c0_0 = arith.constant 0 : index
    %0 = vector.load %arg2[%c0, %c0_0] : memref<3x32xf32, #tpu.memory_space<vmem>>, vector<1x32xf32>
    %c1 = arith.constant 1 : index
    %c0_1 = arith.constant 0 : index
    %1 = vector.load %arg2[%c1, %c0_1] : memref<3x32xf32, #tpu.memory_space<vmem>>, vector<1x32xf32>
    %c2 = arith.constant 2 : index
    %c0_2 = arith.constant 0 : index
    %2 = vector.load %arg2[%c2, %c0_2] : memref<3x32xf32, #tpu.memory_space<vmem>>, vector<1x32xf32>
    %c0_3 = arith.constant 0 : index
    %c0_4 = arith.constant 0 : index
    %3 = vector.load %arg0[%c0_3, %c0_4] : memref<16x32xf32, #tpu.memory_space<vmem>>, vector<16x32xf32>
    %cst = arith.constant dense<0.000000e+00> : vector<16xf32>
    %4 = vector.multi_reduction <add>, %3, %cst [1] : vector<16x32xf32> to vector<16xf32>
    %5 = vector.shape_cast %4 : vector<16xf32> to vector<16x1xf32>
    %cst_5 = arith.constant 3.200000e+01 : f32
    %6 = vector.broadcast %cst_5 : f32 to vector<16x1xf32>
    %7 = arith.divf %5, %6 : vector<16x1xf32>
    %8 = vector.broadcast %7 : vector<16x1xf32> to vector<16x32xf32>
    %9 = arith.subf %3, %8 : vector<16x32xf32>
    %10 = arith.mulf %9, %9 : vector<16x32xf32>
    %cst_6 = arith.constant dense<0.000000e+00> : vector<16xf32>
    %11 = vector.multi_reduction <add>, %10, %cst_6 [1] : vector<16x32xf32> to vector<16xf32>
    %12 = vector.shape_cast %11 : vector<16xf32> to vector<16x1xf32>
    %cst_7 = arith.constant 3.200000e+01 : f32
    %13 = vector.broadcast %cst_7 : f32 to vector<16x1xf32>
    %14 = arith.divf %12, %13 : vector<16x1xf32>
    %15 = vector.broadcast %7 : vector<16x1xf32> to vector<16x32xf32>
    %16 = arith.subf %3, %15 : vector<16x32xf32>
    %cst_8 = arith.constant 9.99999996E-13 : f32
    %17 = vector.broadcast %cst_8 : f32 to vector<16x1xf32>
    %18 = arith.addf %14, %17 : vector<16x1xf32>
    %19 = math.rsqrt %18 : vector<16x1xf32>
    %20 = vector.broadcast %19 : vector<16x1xf32> to vector<16x32xf32>
    %21 = arith.mulf %16, %20 : vector<16x32xf32>
    %22 = vector.broadcast %0 : vector<1x32xf32> to vector<16x32xf32>
    %23 = arith.mulf %21, %22 : vector<16x32xf32>
    %24 = vector.broadcast %1 : vector<1x32xf32> to vector<16x32xf32>
    %25 = arith.addf %23, %24 : vector<16x32xf32>
    %c0_9 = arith.constant 0 : index
    %c0_10 = arith.constant 0 : index
    %26 = vector.load %arg1[%c0_9, %c0_10] : memref<16x16xf32, #tpu.memory_space<vmem>>, vector<16x16xf32>
    %c0_11 = arith.constant 0 : index
    %c0_12 = arith.constant 0 : index
    %c0_13 = arith.constant 0 : index
    %27 = vector.load %arg3[%c0_11, %c0_12, %c0_13] : memref<2x32x128xbf16, #tpu.memory_space<vmem>>, vector<1x32x128xbf16>
    %28 = vector.shape_cast %27 : vector<1x32x128xbf16> to vector<32x128xbf16>
    %29 = arith.extf %28 : vector<32x128xbf16> to vector<32x128xf32>
    %c0_14 = arith.constant 0 : index
    %c0_15 = arith.constant 0 : index
    %c0_16 = arith.constant 0 : index
    %30 = vector.load %arg6[%c0_14, %c0_15, %c0_16] : memref<2x8x96xf32, #tpu.memory_space<vmem>>, vector<1x8x96xf32>
    %31 = vector.shape_cast %30 : vector<1x8x96xf32> to vector<8x96xf32>
    %32 = vector.extract_strided_slice %31 {offsets = [0, 0], sizes = [1, 96], strides = [1, 1]} : vector<8x96xf32> to vector<1x96xf32>
    %33 = vector.extract_strided_slice %31 {offsets = [1, 0], sizes = [1, 32], strides = [1, 1]} : vector<8x96xf32> to vector<1x32xf32>
    %34 = vector.extract_strided_slice %31 {offsets = [2, 0], sizes = [1, 64], strides = [1, 1]} : vector<8x96xf32> to vector<1x64xf32>
    %35 = vector.extract_strided_slice %31 {offsets = [3, 0], sizes = [1, 32], strides = [1, 1]} : vector<8x96xf32> to vector<1x32xf32>
    %36 = vector.extract_strided_slice %31 {offsets = [4, 0], sizes = [1, 32], strides = [1, 1]} : vector<8x96xf32> to vector<1x32xf32>
    %37 = vector.extract_strided_slice %31 {offsets = [5, 0], sizes = [1, 32], strides = [1, 1]} : vector<8x96xf32> to vector<1x32xf32>
    %38 = vector.extract_strided_slice %31 {offsets = [6, 0], sizes = [1, 32], strides = [1, 1]} : vector<8x96xf32> to vector<1x32xf32>
    %39 = vector.extract_strided_slice %31 {offsets = [7, 0], sizes = [1, 32], strides = [1, 1]} : vector<8x96xf32> to vector<1x32xf32>
    %40 = vector.extract_strided_slice %29 {offsets = [0, 0], sizes = [32, 96], strides = [1, 1]} : vector<32x128xf32> to vector<32x96xf32>
    %cst_17 = arith.constant dense<0.000000e+00> : vector<16x96xf32>
    %41 = tpu.matmul %25, %40, %cst_17 {dimension_numbers = #tpu.dot_dimension_numbers<[1], [0], [0], [1], [0, 0, 1, 1], [], []>} : vector<16x32xf32>, vector<32x96xf32>, vector<16x96xf32> -> vector<16x96xf32>
    %42 = vector.broadcast %32 : vector<1x96xf32> to vector<16x96xf32>
    %43 = arith.addf %41, %42 : vector<16x96xf32>
    %44 = vector.extract_strided_slice %43 {offsets = [0, 0], sizes = [16, 8], strides = [1, 1]} : vector<16x96xf32> to vector<16x8xf32>
    %45 = vector.extract_strided_slice %43 {offsets = [0, 32], sizes = [16, 8], strides = [1, 1]} : vector<16x96xf32> to vector<16x8xf32>
    %46 = vector.extract_strided_slice %43 {offsets = [0, 64], sizes = [16, 8], strides = [1, 1]} : vector<16x96xf32> to vector<16x8xf32>
    %cst_18 = arith.constant dense<0.000000e+00> : vector<16x16xf32>
    %47 = tpu.matmul %44, %45, %cst_18 {dimension_numbers = #tpu.dot_dimension_numbers<[1], [1], [0], [0], [0, 0, 1, 0], [], []>} : vector<16x8xf32>, vector<16x8xf32>, vector<16x16xf32> -> vector<16x16xf32>
    %cst_19 = arith.constant 0.353553385 : f32
    %48 = vector.broadcast %cst_19 : f32 to vector<16x16xf32>
    %49 = arith.mulf %47, %48 : vector<16x16xf32>
    %50 = arith.addf %49, %26 : vector<16x16xf32>
    %cst_20 = arith.constant dense<0xFF800000> : vector<16xf32>
    %51 = vector.multi_reduction <maximumf>, %50, %cst_20 [1] : vector<16x16xf32> to vector<16xf32>
    %52 = vector.shape_cast %51 : vector<16xf32> to vector<16x1xf32>
    %53 = vector.broadcast %52 : vector<16x1xf32> to vector<16x16xf32>
    %54 = arith.subf %50, %53 : vector<16x16xf32>
    %55 = math.exp %54 : vector<16x16xf32>
    %cst_21 = arith.constant dense<0.000000e+00> : vector<16xf32>
    %56 = vector.multi_reduction <add>, %55, %cst_21 [1] : vector<16x16xf32> to vector<16xf32>
    %57 = vector.shape_cast %56 : vector<16xf32> to vector<16x1xf32>
    %58 = tpu.reciprocal %57 {approx = true} : vector<16x1xf32> -> vector<16x1xf32>
    %59 = vector.broadcast %58 : vector<16x1xf32> to vector<16x16xf32>
    %60 = arith.mulf %55, %59 : vector<16x16xf32>
    %cst_22 = arith.constant dense<0.000000e+00> : vector<16x8xf32>
    %61 = tpu.matmul %60, %46, %cst_22 {dimension_numbers = #tpu.dot_dimension_numbers<[1], [0], [0], [1], [0, 0, 1, 1], [], []>} : vector<16x16xf32>, vector<16x8xf32>, vector<16x8xf32> -> vector<16x8xf32>
    %c0_23 = arith.constant 0 : index
    %c0_24 = arith.constant 0 : index
    %62 = vector.load %arg9[%c0_23, %c0_24] : memref<16x32xf32, #tpu.memory_space<vmem>>, vector<16x8xf32>
    tpu.vector_store %arg9[%c0_23, %c0_24], %61 {strides = array<i32>} : memref<16x32xf32, #tpu.memory_space<vmem>>, vector<16x8xf32>,
    %63 = vector.extract_strided_slice %43 {offsets = [0, 8], sizes = [16, 8], strides = [1, 1]} : vector<16x96xf32> to vector<16x8xf32>
    %64 = vector.extract_strided_slice %43 {offsets = [0, 40], sizes = [16, 8], strides = [1, 1]} : vector<16x96xf32> to vector<16x8xf32>
    %65 = vector.extract_strided_slice %43 {offsets = [0, 72], sizes = [16, 8], strides = [1, 1]} : vector<16x96xf32> to vector<16x8xf32>
    %cst_25 = arith.constant dense<0.000000e+00> : vector<16x16xf32>
    %66 = tpu.matmul %63, %64, %cst_25 {dimension_numbers = #tpu.dot_dimension_numbers<[1], [1], [0], [0], [0, 0, 1, 0], [], []>} : vector<16x8xf32>, vector<16x8xf32>, vector<16x16xf32> -> vector<16x16xf32>
    %cst_26 = arith.constant 0.353553385 : f32
    %67 = vector.broadcast %cst_26 : f32 to vector<16x16xf32>
    %68 = arith.mulf %66, %67 : vector<16x16xf32>
    %69 = arith.addf %68, %26 : vector<16x16xf32>
    %cst_27 = arith.constant dense<0xFF800000> : vector<16xf32>
    %70 = vector.multi_reduction <maximumf>, %69, %cst_27 [1] : vector<16x16xf32> to vector<16xf32>
    %71 = vector.shape_cast %70 : vector<16xf32> to vector<16x1xf32>
    %72 = vector.broadcast %71 : vector<16x1xf32> to vector<16x16xf32>
    %73 = arith.subf %69, %72 : vector<16x16xf32>
    %74 = math.exp %73 : vector<16x16xf32>
    %cst_28 = arith.constant dense<0.000000e+00> : vector<16xf32>
    %75 = vector.multi_reduction <add>, %74, %cst_28 [1] : vector<16x16xf32> to vector<16xf32>
    %76 = vector.shape_cast %75 : vector<16xf32> to vector<16x1xf32>
    %77 = tpu.reciprocal %76 {approx = true} : vector<16x1xf32> -> vector<16x1xf32>
    %78 = vector.broadcast %77 : vector<16x1xf32> to vector<16x16xf32>
    %79 = arith.mulf %74, %78 : vector<16x16xf32>
    %cst_29 = arith.constant dense<0.000000e+00> : vector<16x8xf32>
    %80 = tpu.matmul %79, %65, %cst_29 {dimension_numbers = #tpu.dot_dimension_numbers<[1], [0], [0], [1], [0, 0, 1, 1], [], []>} : vector<16x16xf32>, vector<16x8xf32>, vector<16x8xf32> -> vector<16x8xf32>
    %c0_30 = arith.constant 0 : index
    %c8 = arith.constant 8 : index
    %81 = vector.load %arg9[%c0_30, %c8] : memref<16x32xf32, #tpu.memory_space<vmem>>, vector<16x8xf32>
    tpu.vector_store %arg9[%c0_30, %c8], %80 {strides = array<i32>} : memref<16x32xf32, #tpu.memory_space<vmem>>, vector<16x8xf32>,
    %82 = vector.extract_strided_slice %43 {offsets = [0, 16], sizes = [16, 8], strides = [1, 1]} : vector<16x96xf32> to vector<16x8xf32>
    %83 = vector.extract_strided_slice %43 {offsets = [0, 48], sizes = [16, 8], strides = [1, 1]} : vector<16x96xf32> to vector<16x8xf32>
    %84 = vector.extract_strided_slice %43 {offsets = [0, 80], sizes = [16, 8], strides = [1, 1]} : vector<16x96xf32> to vector<16x8xf32>
    %cst_31 = arith.constant dense<0.000000e+00> : vector<16x16xf32>
    %85 = tpu.matmul %82, %83, %cst_31 {dimension_numbers = #tpu.dot_dimension_numbers<[1], [1], [0], [0], [0, 0, 1, 0], [], []>} : vector<16x8xf32>, vector<16x8xf32>, vector<16x16xf32> -> vector<16x16xf32>
    %cst_32 = arith.constant 0.353553385 : f32
    %86 = vector.broadcast %cst_32 : f32 to vector<16x16xf32>
    %87 = arith.mulf %85, %86 : vector<16x16xf32>
    %88 = arith.addf %87, %26 : vector<16x16xf32>
    %cst_33 = arith.constant dense<0xFF800000> : vector<16xf32>
    %89 = vector.multi_reduction <maximumf>, %88, %cst_33 [1] : vector<16x16xf32> to vector<16xf32>
    %90 = vector.shape_cast %89 : vector<16xf32> to vector<16x1xf32>
    %91 = vector.broadcast %90 : vector<16x1xf32> to vector<16x16xf32>
    %92 = arith.subf %88, %91 : vector<16x16xf32>
    %93 = math.exp %92 : vector<16x16xf32>
    %cst_34 = arith.constant dense<0.000000e+00> : vector<16xf32>
    %94 = vector.multi_reduction <add>, %93, %cst_34 [1] : vector<16x16xf32> to vector<16xf32>
    %95 = vector.shape_cast %94 : vector<16xf32> to vector<16x1xf32>
    %96 = tpu.reciprocal %95 {approx = true} : vector<16x1xf32> -> vector<16x1xf32>
    %97 = vector.broadcast %96 : vector<16x1xf32> to vector<16x16xf32>
    %98 = arith.mulf %93, %97 : vector<16x16xf32>
    %cst_35 = arith.constant dense<0.000000e+00> : vector<16x8xf32>
    %99 = tpu.matmul %98, %84, %cst_35 {dimension_numbers = #tpu.dot_dimension_numbers<[1], [0], [0], [1], [0, 0, 1, 1], [], []>} : vector<16x16xf32>, vector<16x8xf32>, vector<16x8xf32> -> vector<16x8xf32>
    %c0_36 = arith.constant 0 : index
    %c16 = arith.constant 16 : index
    %100 = vector.load %arg9[%c0_36, %c16] : memref<16x32xf32, #tpu.memory_space<vmem>>, vector<16x8xf32>
    tpu.vector_store %arg9[%c0_36, %c16], %99 {strides = array<i32>} : memref<16x32xf32, #tpu.memory_space<vmem>>, vector<16x8xf32>,
    %101 = vector.extract_strided_slice %43 {offsets = [0, 24], sizes = [16, 8], strides = [1, 1]} : vector<16x96xf32> to vector<16x8xf32>
    %102 = vector.extract_strided_slice %43 {offsets = [0, 56], sizes = [16, 8], strides = [1, 1]} : vector<16x96xf32> to vector<16x8xf32>
    %103 = vector.extract_strided_slice %43 {offsets = [0, 88], sizes = [16, 8], strides = [1, 1]} : vector<16x96xf32> to vector<16x8xf32>
    %cst_37 = arith.constant dense<0.000000e+00> : vector<16x16xf32>
    %104 = tpu.matmul %101, %102, %cst_37 {dimension_numbers = #tpu.dot_dimension_numbers<[1], [1], [0], [0], [0, 0, 1, 0], [], []>} : vector<16x8xf32>, vector<16x8xf32>, vector<16x16xf32> -> vector<16x16xf32>
    %cst_38 = arith.constant 0.353553385 : f32
    %105 = vector.broadcast %cst_38 : f32 to vector<16x16xf32>
    %106 = arith.mulf %104, %105 : vector<16x16xf32>
    %107 = arith.addf %106, %26 : vector<16x16xf32>
    %cst_39 = arith.constant dense<0xFF800000> : vector<16xf32>
    %108 = vector.multi_reduction <maximumf>, %107, %cst_39 [1] : vector<16x16xf32> to vector<16xf32>
    %109 = vector.shape_cast %108 : vector<16xf32> to vector<16x1xf32>
    %110 = vector.broadcast %109 : vector<16x1xf32> to vector<16x16xf32>
    %111 = arith.subf %107, %110 : vector<16x16xf32>
    %112 = math.exp %111 : vector<16x16xf32>
    %cst_40 = arith.constant dense<0.000000e+00> : vector<16xf32>
    %113 = vector.multi_reduction <add>, %112, %cst_40 [1] : vector<16x16xf32> to vector<16xf32>
    %114 = vector.shape_cast %113 : vector<16xf32> to vector<16x1xf32>
    %115 = tpu.reciprocal %114 {approx = true} : vector<16x1xf32> -> vector<16x1xf32>
    %116 = vector.broadcast %115 : vector<16x1xf32> to vector<16x16xf32>
    %117 = arith.mulf %112, %116 : vector<16x16xf32>
    %cst_41 = arith.constant dense<0.000000e+00> : vector<16x8xf32>
    %118 = tpu.matmul %117, %103, %cst_41 {dimension_numbers = #tpu.dot_dimension_numbers<[1], [0], [0], [1], [0, 0, 1, 1], [], []>} : vector<16x16xf32>, vector<16x8xf32>, vector<16x8xf32> -> vector<16x8xf32>
    %c0_42 = arith.constant 0 : index
    %c24 = arith.constant 24 : index
    %119 = vector.load %arg9[%c0_42, %c24] : memref<16x32xf32, #tpu.memory_space<vmem>>, vector<16x8xf32>
    tpu.vector_store %arg9[%c0_42, %c24], %118 {strides = array<i32>} : memref<16x32xf32, #tpu.memory_space<vmem>>, vector<16x8xf32>,
    %c0_43 = arith.constant 0 : index
    %c0_44 = arith.constant 0 : index
    %120 = vector.load %arg9[%c0_43, %c0_44] : memref<16x32xf32, #tpu.memory_space<vmem>>, vector<16x32xf32>
    %121 = vector.extract_strided_slice %29 {offsets = [0, 96], sizes = [32, 32], strides = [1, 1]} : vector<32x128xf32> to vector<32x32xf32>
    %cst_45 = arith.constant dense<0.000000e+00> : vector<16x32xf32>
    %122 = tpu.matmul %120, %121, %cst_45 {dimension_numbers = #tpu.dot_dimension_numbers<[1], [0], [0], [1], [0, 0, 1, 1], [], []>} : vector<16x32xf32>, vector<32x32xf32>, vector<16x32xf32> -> vector<16x32xf32>
    %123 = vector.broadcast %33 : vector<1x32xf32> to vector<16x32xf32>
    %124 = arith.addf %122, %123 : vector<16x32xf32>
    %125 = arith.addf %25, %124 : vector<16x32xf32>
    %cst_46 = arith.constant dense<0.000000e+00> : vector<16xf32>
    %126 = vector.multi_reduction <add>, %125, %cst_46 [1] : vector<16x32xf32> to vector<16xf32>
    %127 = vector.shape_cast %126 : vector<16xf32> to vector<16x1xf32>
    %cst_47 = arith.constant 3.200000e+01 : f32
    %128 = vector.broadcast %cst_47 : f32 to vector<16x1xf32>
    %129 = arith.divf %127, %128 : vector<16x1xf32>
    %130 = vector.broadcast %129 : vector<16x1xf32> to vector<16x32xf32>
    %131 = arith.subf %125, %130 : vector<16x32xf32>
    %132 = arith.mulf %131, %131 : vector<16x32xf32>
    %cst_48 = arith.constant dense<0.000000e+00> : vector<16xf32>
    %133 = vector.multi_reduction <add>, %132, %cst_48 [1] : vector<16x32xf32> to vector<16xf32>
    %134 = vector.shape_cast %133 : vector<16xf32> to vector<16x1xf32>
    %cst_49 = arith.constant 3.200000e+01 : f32
    %135 = vector.broadcast %cst_49 : f32 to vector<16x1xf32>
    %136 = arith.divf %134, %135 : vector<16x1xf32>
    %137 = vector.broadcast %129 : vector<16x1xf32> to vector<16x32xf32>
    %138 = arith.subf %125, %137 : vector<16x32xf32>
    %cst_50 = arith.constant 9.99999996E-13 : f32
    %139 = vector.broadcast %cst_50 : f32 to vector<16x1xf32>
    %140 = arith.addf %136, %139 : vector<16x1xf32>
    %141 = math.rsqrt %140 : vector<16x1xf32>
    %142 = vector.broadcast %141 : vector<16x1xf32> to vector<16x32xf32>
    %143 = arith.mulf %138, %142 : vector<16x32xf32>
    %144 = vector.broadcast %36 : vector<1x32xf32> to vector<16x32xf32>
    %145 = arith.mulf %143, %144 : vector<16x32xf32>
    %146 = vector.broadcast %37 : vector<1x32xf32> to vector<16x32xf32>
    %147 = arith.addf %145, %146 : vector<16x32xf32>
    %c0_51 = arith.constant 0 : index
    %c0_52 = arith.constant 0 : index
    %c0_53 = arith.constant 0 : index
    %148 = vector.load %arg4[%c0_51, %c0_52, %c0_53] : memref<2x32x64xbf16, #tpu.memory_space<vmem>>, vector<1x32x64xbf16>
    %149 = vector.shape_cast %148 : vector<1x32x64xbf16> to vector<32x64xbf16>
    %150 = arith.extf %149 : vector<32x64xbf16> to vector<32x64xf32>
    %cst_54 = arith.constant dense<0.000000e+00> : vector<16x64xf32>
    %151 = tpu.matmul %147, %150, %cst_54 {dimension_numbers = #tpu.dot_dimension_numbers<[1], [0], [0], [1], [0, 0, 1, 1], [], []>} : vector<16x32xf32>, vector<32x64xf32>, vector<16x64xf32> -> vector<16x64xf32>
    %152 = vector.broadcast %34 : vector<1x64xf32> to vector<16x64xf32>
    %153 = arith.addf %151, %152 : vector<16x64xf32>
    %cst_55 = arith.constant 5.000000e-01 : f32
    %154 = vector.broadcast %cst_55 : f32 to vector<16x64xf32>
    %155 = arith.mulf %154, %153 : vector<16x64xf32>
    %cst_56 = arith.constant 4.471500e-02 : f32
    %156 = vector.broadcast %cst_56 : f32 to vector<16x64xf32>
    %157 = arith.mulf %156, %153 : vector<16x64xf32>
    %158 = arith.mulf %157, %153 : vector<16x64xf32>
    %159 = arith.mulf %158, %153 : vector<16x64xf32>
    %160 = arith.addf %153, %159 : vector<16x64xf32>
    %cst_57 = arith.constant 0.797884583 : f32
    %161 = vector.broadcast %cst_57 : f32 to vector<16x64xf32>
    %162 = arith.mulf %161, %160 : vector<16x64xf32>
    %163 = math.tanh %162 : vector<16x64xf32>
    %cst_58 = arith.constant 1.000000e+00 : f32
    %164 = vector.broadcast %cst_58 : f32 to vector<16x64xf32>
    %165 = arith.addf %164, %163 : vector<16x64xf32>
    %166 = arith.mulf %155, %165 : vector<16x64xf32>
    %c0_59 = arith.constant 0 : index
    %c0_60 = arith.constant 0 : index
    %c0_61 = arith.constant 0 : index
    %167 = vector.load %arg5[%c0_59, %c0_60, %c0_61] : memref<2x64x32xbf16, #tpu.memory_space<vmem>>, vector<1x64x32xbf16>
    %168 = vector.shape_cast %167 : vector<1x64x32xbf16> to vector<64x32xbf16>
    %169 = arith.extf %168 : vector<64x32xbf16> to vector<64x32xf32>
    %cst_62 = arith.constant dense<0.000000e+00> : vector<16x32xf32>
    %170 = tpu.matmul %166, %169, %cst_62 {dimension_numbers = #tpu.dot_dimension_numbers<[1], [0], [0], [1], [0, 0, 1, 1], [], []>} : vector<16x64xf32>, vector<64x32xf32>, vector<16x32xf32> -> vector<16x32xf32>
    %171 = vector.broadcast %35 : vector<1x32xf32> to vector<16x32xf32>
    %172 = arith.addf %170, %171 : vector<16x32xf32>
    %173 = arith.addf %147, %172 : vector<16x32xf32>
    %cst_63 = arith.constant dense<0.000000e+00> : vector<16xf32>
    %174 = vector.multi_reduction <add>, %173, %cst_63 [1] : vector<16x32xf32> to vector<16xf32>
    %175 = vector.shape_cast %174 : vector<16xf32> to vector<16x1xf32>
    %cst_64 = arith.constant 3.200000e+01 : f32
    %176 = vector.broadcast %cst_64 : f32 to vector<16x1xf32>
    %177 = arith.divf %175, %176 : vector<16x1xf32>
    %178 = vector.broadcast %177 : vector<16x1xf32> to vector<16x32xf32>
    %179 = arith.subf %173, %178 : vector<16x32xf32>
    %180 = arith.mulf %179, %179 : vector<16x32xf32>
    %cst_65 = arith.constant dense<0.000000e+00> : vector<16xf32>
    %181 = vector.multi_reduction <add>, %180, %cst_65 [1] : vector<16x32xf32> to vector<16xf32>
    %182 = vector.shape_cast %181 : vector<16xf32> to vector<16x1xf32>
    %cst_66 = arith.constant 3.200000e+01 : f32
    %183 = vector.broadcast %cst_66 : f32 to vector<16x1xf32>
    %184 = arith.divf %182, %183 : vector<16x1xf32>
    %185 = vector.broadcast %177 : vector<16x1xf32> to vector<16x32xf32>
    %186 = arith.subf %173, %185 : vector<16x32xf32>
    %cst_67 = arith.constant 9.99999996E-13 : f32
    %187 = vector.broadcast %cst_67 : f32 to vector<16x1xf32>
    %188 = arith.addf %184, %187 : vector<16x1xf32>
    %189 = math.rsqrt %188 : vector<16x1xf32>
    %190 = vector.broadcast %189 : vector<16x1xf32> to vector<16x32xf32>
    %191 = arith.mulf %186, %190 : vector<16x32xf32>
    %192 = vector.broadcast %38 : vector<1x32xf32> to vector<16x32xf32>
    %193 = arith.mulf %191, %192 : vector<16x32xf32>
    %194 = vector.broadcast %39 : vector<1x32xf32> to vector<16x32xf32>
    %195 = arith.addf %193, %194 : vector<16x32xf32>
    %c1_68 = arith.constant 1 : index
    %c0_69 = arith.constant 0 : index
    %c0_70 = arith.constant 0 : index
    %196 = vector.load %arg3[%c1_68, %c0_69, %c0_70] : memref<2x32x128xbf16, #tpu.memory_space<vmem>>, vector<1x32x128xbf16>
    %197 = vector.shape_cast %196 : vector<1x32x128xbf16> to vector<32x128xbf16>
    %198 = arith.extf %197 : vector<32x128xbf16> to vector<32x128xf32>
    %c1_71 = arith.constant 1 : index
    %c0_72 = arith.constant 0 : index
    %c0_73 = arith.constant 0 : index
    %199 = vector.load %arg6[%c1_71, %c0_72, %c0_73] : memref<2x8x96xf32, #tpu.memory_space<vmem>>, vector<1x8x96xf32>
    %200 = vector.shape_cast %199 : vector<1x8x96xf32> to vector<8x96xf32>
    %201 = vector.extract_strided_slice %200 {offsets = [0, 0], sizes = [1, 96], strides = [1, 1]} : vector<8x96xf32> to vector<1x96xf32>
    %202 = vector.extract_strided_slice %200 {offsets = [1, 0], sizes = [1, 32], strides = [1, 1]} : vector<8x96xf32> to vector<1x32xf32>
    %203 = vector.extract_strided_slice %200 {offsets = [2, 0], sizes = [1, 64], strides = [1, 1]} : vector<8x96xf32> to vector<1x64xf32>
    %204 = vector.extract_strided_slice %200 {offsets = [3, 0], sizes = [1, 32], strides = [1, 1]} : vector<8x96xf32> to vector<1x32xf32>
    %205 = vector.extract_strided_slice %200 {offsets = [4, 0], sizes = [1, 32], strides = [1, 1]} : vector<8x96xf32> to vector<1x32xf32>
    %206 = vector.extract_strided_slice %200 {offsets = [5, 0], sizes = [1, 32], strides = [1, 1]} : vector<8x96xf32> to vector<1x32xf32>
    %207 = vector.extract_strided_slice %200 {offsets = [6, 0], sizes = [1, 32], strides = [1, 1]} : vector<8x96xf32> to vector<1x32xf32>
    %208 = vector.extract_strided_slice %200 {offsets = [7, 0], sizes = [1, 32], strides = [1, 1]} : vector<8x96xf32> to vector<1x32xf32>
    %209 = vector.extract_strided_slice %198 {offsets = [0, 0], sizes = [32, 96], strides = [1, 1]} : vector<32x128xf32> to vector<32x96xf32>
    %cst_74 = arith.constant dense<0.000000e+00> : vector<16x96xf32>
    %210 = tpu.matmul %195, %209, %cst_74 {dimension_numbers = #tpu.dot_dimension_numbers<[1], [0], [0], [1], [0, 0, 1, 1], [], []>} : vector<16x32xf32>, vector<32x96xf32>, vector<16x96xf32> -> vector<16x96xf32>
    %211 = vector.broadcast %201 : vector<1x96xf32> to vector<16x96xf32>
    %212 = arith.addf %210, %211 : vector<16x96xf32>
    %213 = vector.extract_strided_slice %212 {offsets = [0, 0], sizes = [16, 8], strides = [1, 1]} : vector<16x96xf32> to vector<16x8xf32>
    %214 = vector.extract_strided_slice %212 {offsets = [0, 32], sizes = [16, 8], strides = [1, 1]} : vector<16x96xf32> to vector<16x8xf32>
    %215 = vector.extract_strided_slice %212 {offsets = [0, 64], sizes = [16, 8], strides = [1, 1]} : vector<16x96xf32> to vector<16x8xf32>
    %cst_75 = arith.constant dense<0.000000e+00> : vector<16x16xf32>
    %216 = tpu.matmul %213, %214, %cst_75 {dimension_numbers = #tpu.dot_dimension_numbers<[1], [1], [0], [0], [0, 0, 1, 0], [], []>} : vector<16x8xf32>, vector<16x8xf32>, vector<16x16xf32> -> vector<16x16xf32>
    %cst_76 = arith.constant 0.353553385 : f32
    %217 = vector.broadcast %cst_76 : f32 to vector<16x16xf32>
    %218 = arith.mulf %216, %217 : vector<16x16xf32>
    %219 = arith.addf %218, %26 : vector<16x16xf32>
    %cst_77 = arith.constant dense<0xFF800000> : vector<16xf32>
    %220 = vector.multi_reduction <maximumf>, %219, %cst_77 [1] : vector<16x16xf32> to vector<16xf32>
    %221 = vector.shape_cast %220 : vector<16xf32> to vector<16x1xf32>
    %222 = vector.broadcast %221 : vector<16x1xf32> to vector<16x16xf32>
    %223 = arith.subf %219, %222 : vector<16x16xf32>
    %224 = math.exp %223 : vector<16x16xf32>
    %cst_78 = arith.constant dense<0.000000e+00> : vector<16xf32>
    %225 = vector.multi_reduction <add>, %224, %cst_78 [1] : vector<16x16xf32> to vector<16xf32>
    %226 = vector.shape_cast %225 : vector<16xf32> to vector<16x1xf32>
    %227 = tpu.reciprocal %226 {approx = true} : vector<16x1xf32> -> vector<16x1xf32>
    %228 = vector.broadcast %227 : vector<16x1xf32> to vector<16x16xf32>
    %229 = arith.mulf %224, %228 : vector<16x16xf32>
    %cst_79 = arith.constant dense<0.000000e+00> : vector<16x8xf32>
    %230 = tpu.matmul %229, %215, %cst_79 {dimension_numbers = #tpu.dot_dimension_numbers<[1], [0], [0], [1], [0, 0, 1, 1], [], []>} : vector<16x16xf32>, vector<16x8xf32>, vector<16x8xf32> -> vector<16x8xf32>
    %c0_80 = arith.constant 0 : index
    %c0_81 = arith.constant 0 : index
    %231 = vector.load %arg9[%c0_80, %c0_81] : memref<16x32xf32, #tpu.memory_space<vmem>>, vector<16x8xf32>
    tpu.vector_store %arg9[%c0_80, %c0_81], %230 {strides = array<i32>} : memref<16x32xf32, #tpu.memory_space<vmem>>, vector<16x8xf32>,
    %232 = vector.extract_strided_slice %212 {offsets = [0, 8], sizes = [16, 8], strides = [1, 1]} : vector<16x96xf32> to vector<16x8xf32>
    %233 = vector.extract_strided_slice %212 {offsets = [0, 40], sizes = [16, 8], strides = [1, 1]} : vector<16x96xf32> to vector<16x8xf32>
    %234 = vector.extract_strided_slice %212 {offsets = [0, 72], sizes = [16, 8], strides = [1, 1]} : vector<16x96xf32> to vector<16x8xf32>
    %cst_82 = arith.constant dense<0.000000e+00> : vector<16x16xf32>
    %235 = tpu.matmul %232, %233, %cst_82 {dimension_numbers = #tpu.dot_dimension_numbers<[1], [1], [0], [0], [0, 0, 1, 0], [], []>} : vector<16x8xf32>, vector<16x8xf32>, vector<16x16xf32> -> vector<16x16xf32>
    %cst_83 = arith.constant 0.353553385 : f32
    %236 = vector.broadcast %cst_83 : f32 to vector<16x16xf32>
    %237 = arith.mulf %235, %236 : vector<16x16xf32>
    %238 = arith.addf %237, %26 : vector<16x16xf32>
    %cst_84 = arith.constant dense<0xFF800000> : vector<16xf32>
    %239 = vector.multi_reduction <maximumf>, %238, %cst_84 [1] : vector<16x16xf32> to vector<16xf32>
    %240 = vector.shape_cast %239 : vector<16xf32> to vector<16x1xf32>
    %241 = vector.broadcast %240 : vector<16x1xf32> to vector<16x16xf32>
    %242 = arith.subf %238, %241 : vector<16x16xf32>
    %243 = math.exp %242 : vector<16x16xf32>
    %cst_85 = arith.constant dense<0.000000e+00> : vector<16xf32>
    %244 = vector.multi_reduction <add>, %243, %cst_85 [1] : vector<16x16xf32> to vector<16xf32>
    %245 = vector.shape_cast %244 : vector<16xf32> to vector<16x1xf32>
    %246 = tpu.reciprocal %245 {approx = true} : vector<16x1xf32> -> vector<16x1xf32>
    %247 = vector.broadcast %246 : vector<16x1xf32> to vector<16x16xf32>
    %248 = arith.mulf %243, %247 : vector<16x16xf32>
    %cst_86 = arith.constant dense<0.000000e+00> : vector<16x8xf32>
    %249 = tpu.matmul %248, %234, %cst_86 {dimension_numbers = #tpu.dot_dimension_numbers<[1], [0], [0], [1], [0, 0, 1, 1], [], []>} : vector<16x16xf32>, vector<16x8xf32>, vector<16x8xf32> -> vector<16x8xf32>
    %c0_87 = arith.constant 0 : index
    %c8_88 = arith.constant 8 : index
    %250 = vector.load %arg9[%c0_87, %c8_88] : memref<16x32xf32, #tpu.memory_space<vmem>>, vector<16x8xf32>
    tpu.vector_store %arg9[%c0_87, %c8_88], %249 {strides = array<i32>} : memref<16x32xf32, #tpu.memory_space<vmem>>, vector<16x8xf32>,
    %251 = vector.extract_strided_slice %212 {offsets = [0, 16], sizes = [16, 8], strides = [1, 1]} : vector<16x96xf32> to vector<16x8xf32>
    %252 = vector.extract_strided_slice %212 {offsets = [0, 48], sizes = [16, 8], strides = [1, 1]} : vector<16x96xf32> to vector<16x8xf32>
    %253 = vector.extract_strided_slice %212 {offsets = [0, 80], sizes = [16, 8], strides = [1, 1]} : vector<16x96xf32> to vector<16x8xf32>
    %cst_89 = arith.constant dense<0.000000e+00> : vector<16x16xf32>
    %254 = tpu.matmul %251, %252, %cst_89 {dimension_numbers = #tpu.dot_dimension_numbers<[1], [1], [0], [0], [0, 0, 1, 0], [], []>} : vector<16x8xf32>, vector<16x8xf32>, vector<16x16xf32> -> vector<16x16xf32>
    %cst_90 = arith.constant 0.353553385 : f32
    %255 = vector.broadcast %cst_90 : f32 to vector<16x16xf32>
    %256 = arith.mulf %254, %255 : vector<16x16xf32>
    %257 = arith.addf %256, %26 : vector<16x16xf32>
    %cst_91 = arith.constant dense<0xFF800000> : vector<16xf32>
    %258 = vector.multi_reduction <maximumf>, %257, %cst_91 [1] : vector<16x16xf32> to vector<16xf32>
    %259 = vector.shape_cast %258 : vector<16xf32> to vector<16x1xf32>
    %260 = vector.broadcast %259 : vector<16x1xf32> to vector<16x16xf32>
    %261 = arith.subf %257, %260 : vector<16x16xf32>
    %262 = math.exp %261 : vector<16x16xf32>
    %cst_92 = arith.constant dense<0.000000e+00> : vector<16xf32>
    %263 = vector.multi_reduction <add>, %262, %cst_92 [1] : vector<16x16xf32> to vector<16xf32>
    %264 = vector.shape_cast %263 : vector<16xf32> to vector<16x1xf32>
    %265 = tpu.reciprocal %264 {approx = true} : vector<16x1xf32> -> vector<16x1xf32>
    %266 = vector.broadcast %265 : vector<16x1xf32> to vector<16x16xf32>
    %267 = arith.mulf %262, %266 : vector<16x16xf32>
    %cst_93 = arith.constant dense<0.000000e+00> : vector<16x8xf32>
    %268 = tpu.matmul %267, %253, %cst_93 {dimension_numbers = #tpu.dot_dimension_numbers<[1], [0], [0], [1], [0, 0, 1, 1], [], []>} : vector<16x16xf32>, vector<16x8xf32>, vector<16x8xf32> -> vector<16x8xf32>
    %c0_94 = arith.constant 0 : index
    %c16_95 = arith.constant 16 : index
    %269 = vector.load %arg9[%c0_94, %c16_95] : memref<16x32xf32, #tpu.memory_space<vmem>>, vector<16x8xf32>
    tpu.vector_store %arg9[%c0_94, %c16_95], %268 {strides = array<i32>} : memref<16x32xf32, #tpu.memory_space<vmem>>, vector<16x8xf32>,
    %270 = vector.extract_strided_slice %212 {offsets = [0, 24], sizes = [16, 8], strides = [1, 1]} : vector<16x96xf32> to vector<16x8xf32>
    %271 = vector.extract_strided_slice %212 {offsets = [0, 56], sizes = [16, 8], strides = [1, 1]} : vector<16x96xf32> to vector<16x8xf32>
    %272 = vector.extract_strided_slice %212 {offsets = [0, 88], sizes = [16, 8], strides = [1, 1]} : vector<16x96xf32> to vector<16x8xf32>
    %cst_96 = arith.constant dense<0.000000e+00> : vector<16x16xf32>
    %273 = tpu.matmul %270, %271, %cst_96 {dimension_numbers = #tpu.dot_dimension_numbers<[1], [1], [0], [0], [0, 0, 1, 0], [], []>} : vector<16x8xf32>, vector<16x8xf32>, vector<16x16xf32> -> vector<16x16xf32>
    %cst_97 = arith.constant 0.353553385 : f32
    %274 = vector.broadcast %cst_97 : f32 to vector<16x16xf32>
    %275 = arith.mulf %273, %274 : vector<16x16xf32>
    %276 = arith.addf %275, %26 : vector<16x16xf32>
    %cst_98 = arith.constant dense<0xFF800000> : vector<16xf32>
    %277 = vector.multi_reduction <maximumf>, %276, %cst_98 [1] : vector<16x16xf32> to vector<16xf32>
    %278 = vector.shape_cast %277 : vector<16xf32> to vector<16x1xf32>
    %279 = vector.broadcast %278 : vector<16x1xf32> to vector<16x16xf32>
    %280 = arith.subf %276, %279 : vector<16x16xf32>
    %281 = math.exp %280 : vector<16x16xf32>
    %cst_99 = arith.constant dense<0.000000e+00> : vector<16xf32>
    %282 = vector.multi_reduction <add>, %281, %cst_99 [1] : vector<16x16xf32> to vector<16xf32>
    %283 = vector.shape_cast %282 : vector<16xf32> to vector<16x1xf32>
    %284 = tpu.reciprocal %283 {approx = true} : vector<16x1xf32> -> vector<16x1xf32>
    %285 = vector.broadcast %284 : vector<16x1xf32> to vector<16x16xf32>
    %286 = arith.mulf %281, %285 : vector<16x16xf32>
    %cst_100 = arith.constant dense<0.000000e+00> : vector<16x8xf32>
    %287 = tpu.matmul %286, %272, %cst_100 {dimension_numbers = #tpu.dot_dimension_numbers<[1], [0], [0], [1], [0, 0, 1, 1], [], []>} : vector<16x16xf32>, vector<16x8xf32>, vector<16x8xf32> -> vector<16x8xf32>
    %c0_101 = arith.constant 0 : index
    %c24_102 = arith.constant 24 : index
    %288 = vector.load %arg9[%c0_101, %c24_102] : memref<16x32xf32, #tpu.memory_space<vmem>>, vector<16x8xf32>
    tpu.vector_store %arg9[%c0_101, %c24_102], %287 {strides = array<i32>} : memref<16x32xf32, #tpu.memory_space<vmem>>, vector<16x8xf32>,
    %c0_103 = arith.constant 0 : index
    %c0_104 = arith.constant 0 : index
    %289 = vector.load %arg9[%c0_103, %c0_104] : memref<16x32xf32, #tpu.memory_space<vmem>>, vector<16x32xf32>
    %290 = vector.extract_strided_slice %198 {offsets = [0, 96], sizes = [32, 32], strides = [1, 1]} : vector<32x128xf32> to vector<32x32xf32>
    %cst_105 = arith.constant dense<0.000000e+00> : vector<16x32xf32>
    %291 = tpu.matmul %289, %290, %cst_105 {dimension_numbers = #tpu.dot_dimension_numbers<[1], [0], [0], [1], [0, 0, 1, 1], [], []>} : vector<16x32xf32>, vector<32x32xf32>, vector<16x32xf32> -> vector<16x32xf32>
    %292 = vector.broadcast %202 : vector<1x32xf32> to vector<16x32xf32>
    %293 = arith.addf %291, %292 : vector<16x32xf32>
    %294 = arith.addf %195, %293 : vector<16x32xf32>
    %cst_106 = arith.constant dense<0.000000e+00> : vector<16xf32>
    %295 = vector.multi_reduction <add>, %294, %cst_106 [1] : vector<16x32xf32> to vector<16xf32>
    %296 = vector.shape_cast %295 : vector<16xf32> to vector<16x1xf32>
    %cst_107 = arith.constant 3.200000e+01 : f32
    %297 = vector.broadcast %cst_107 : f32 to vector<16x1xf32>
    %298 = arith.divf %296, %297 : vector<16x1xf32>
    %299 = vector.broadcast %298 : vector<16x1xf32> to vector<16x32xf32>
    %300 = arith.subf %294, %299 : vector<16x32xf32>
    %301 = arith.mulf %300, %300 : vector<16x32xf32>
    %cst_108 = arith.constant dense<0.000000e+00> : vector<16xf32>
    %302 = vector.multi_reduction <add>, %301, %cst_108 [1] : vector<16x32xf32> to vector<16xf32>
    %303 = vector.shape_cast %302 : vector<16xf32> to vector<16x1xf32>
    %cst_109 = arith.constant 3.200000e+01 : f32
    %304 = vector.broadcast %cst_109 : f32 to vector<16x1xf32>
    %305 = arith.divf %303, %304 : vector<16x1xf32>
    %306 = vector.broadcast %298 : vector<16x1xf32> to vector<16x32xf32>
    %307 = arith.subf %294, %306 : vector<16x32xf32>
    %cst_110 = arith.constant 9.99999996E-13 : f32
    %308 = vector.broadcast %cst_110 : f32 to vector<16x1xf32>
    %309 = arith.addf %305, %308 : vector<16x1xf32>
    %310 = math.rsqrt %309 : vector<16x1xf32>
    %311 = vector.broadcast %310 : vector<16x1xf32> to vector<16x32xf32>
    %312 = arith.mulf %307, %311 : vector<16x32xf32>
    %313 = vector.broadcast %205 : vector<1x32xf32> to vector<16x32xf32>
    %314 = arith.mulf %312, %313 : vector<16x32xf32>
    %315 = vector.broadcast %206 : vector<1x32xf32> to vector<16x32xf32>
    %316 = arith.addf %314, %315 : vector<16x32xf32>
    %c1_111 = arith.constant 1 : index
    %c0_112 = arith.constant 0 : index
    %c0_113 = arith.constant 0 : index
    %317 = vector.load %arg4[%c1_111, %c0_112, %c0_113] : memref<2x32x64xbf16, #tpu.memory_space<vmem>>, vector<1x32x64xbf16>
    %318 = vector.shape_cast %317 : vector<1x32x64xbf16> to vector<32x64xbf16>
    %319 = arith.extf %318 : vector<32x64xbf16> to vector<32x64xf32>
    %cst_114 = arith.constant dense<0.000000e+00> : vector<16x64xf32>
    %320 = tpu.matmul %316, %319, %cst_114 {dimension_numbers = #tpu.dot_dimension_numbers<[1], [0], [0], [1], [0, 0, 1, 1], [], []>} : vector<16x32xf32>, vector<32x64xf32>, vector<16x64xf32> -> vector<16x64xf32>
    %321 = vector.broadcast %203 : vector<1x64xf32> to vector<16x64xf32>
    %322 = arith.addf %320, %321 : vector<16x64xf32>
    %cst_115 = arith.constant 5.000000e-01 : f32
    %323 = vector.broadcast %cst_115 : f32 to vector<16x64xf32>
    %324 = arith.mulf %323, %322 : vector<16x64xf32>
    %cst_116 = arith.constant 4.471500e-02 : f32
    %325 = vector.broadcast %cst_116 : f32 to vector<16x64xf32>
    %326 = arith.mulf %325, %322 : vector<16x64xf32>
    %327 = arith.mulf %326, %322 : vector<16x64xf32>
    %328 = arith.mulf %327, %322 : vector<16x64xf32>
    %329 = arith.addf %322, %328 : vector<16x64xf32>
    %cst_117 = arith.constant 0.797884583 : f32
    %330 = vector.broadcast %cst_117 : f32 to vector<16x64xf32>
    %331 = arith.mulf %330, %329 : vector<16x64xf32>
    %332 = math.tanh %331 : vector<16x64xf32>
    %cst_118 = arith.constant 1.000000e+00 : f32
    %333 = vector.broadcast %cst_118 : f32 to vector<16x64xf32>
    %334 = arith.addf %333, %332 : vector<16x64xf32>
    %335 = arith.mulf %324, %334 : vector<16x64xf32>
    %c1_119 = arith.constant 1 : index
    %c0_120 = arith.constant 0 : index
    %c0_121 = arith.constant 0 : index
    %336 = vector.load %arg5[%c1_119, %c0_120, %c0_121] : memref<2x64x32xbf16, #tpu.memory_space<vmem>>, vector<1x64x32xbf16>
    %337 = vector.shape_cast %336 : vector<1x64x32xbf16> to vector<64x32xbf16>
    %338 = arith.extf %337 : vector<64x32xbf16> to vector<64x32xf32>
    %cst_122 = arith.constant dense<0.000000e+00> : vector<16x32xf32>
    %339 = tpu.matmul %335, %338, %cst_122 {dimension_numbers = #tpu.dot_dimension_numbers<[1], [0], [0], [1], [0, 0, 1, 1], [], []>} : vector<16x64xf32>, vector<64x32xf32>, vector<16x32xf32> -> vector<16x32xf32>
    %340 = vector.broadcast %204 : vector<1x32xf32> to vector<16x32xf32>
    %341 = arith.addf %339, %340 : vector<16x32xf32>
    %342 = arith.addf %316, %341 : vector<16x32xf32>
    %cst_123 = arith.constant dense<0.000000e+00> : vector<16xf32>
    %343 = vector.multi_reduction <add>, %342, %cst_123 [1] : vector<16x32xf32> to vector<16xf32>
    %344 = vector.shape_cast %343 : vector<16xf32> to vector<16x1xf32>
    %cst_124 = arith.constant 3.200000e+01 : f32
    %345 = vector.broadcast %cst_124 : f32 to vector<16x1xf32>
    %346 = arith.divf %344, %345 : vector<16x1xf32>
    %347 = vector.broadcast %346 : vector<16x1xf32> to vector<16x32xf32>
    %348 = arith.subf %342, %347 : vector<16x32xf32>
    %349 = arith.mulf %348, %348 : vector<16x32xf32>
    %cst_125 = arith.constant dense<0.000000e+00> : vector<16xf32>
    %350 = vector.multi_reduction <add>, %349, %cst_125 [1] : vector<16x32xf32> to vector<16xf32>
    %351 = vector.shape_cast %350 : vector<16xf32> to vector<16x1xf32>
    %cst_126 = arith.constant 3.200000e+01 : f32
    %352 = vector.broadcast %cst_126 : f32 to vector<16x1xf32>
    %353 = arith.divf %351, %352 : vector<16x1xf32>
    %354 = vector.broadcast %346 : vector<16x1xf32> to vector<16x32xf32>
    %355 = arith.subf %342, %354 : vector<16x32xf32>
    %cst_127 = arith.constant 9.99999996E-13 : f32
    %356 = vector.broadcast %cst_127 : f32 to vector<16x1xf32>
    %357 = arith.addf %353, %356 : vector<16x1xf32>
    %358 = math.rsqrt %357 : vector<16x1xf32>
    %359 = vector.broadcast %358 : vector<16x1xf32> to vector<16x32xf32>
    %360 = arith.mulf %355, %359 : vector<16x32xf32>
    %361 = vector.broadcast %207 : vector<1x32xf32> to vector<16x32xf32>
    %362 = arith.mulf %360, %361 : vector<16x32xf32>
    %363 = vector.broadcast %208 : vector<1x32xf32> to vector<16x32xf32>
    %364 = arith.addf %362, %363 : vector<16x32xf32>
    %c0_128 = arith.constant 0 : index
    %c0_129 = arith.constant 0 : index
    %365 = vector.load %arg7[%c0_128, %c0_129] : memref<32x32xbf16, #tpu.memory_space<vmem>>, vector<32x32xbf16>
    %366 = arith.extf %365 : vector<32x32xbf16> to vector<32x32xf32>
    %cst_130 = arith.constant dense<0.000000e+00> : vector<16x32xf32>
    %367 = tpu.matmul %364, %366, %cst_130 {dimension_numbers = #tpu.dot_dimension_numbers<[1], [0], [0], [1], [0, 0, 1, 1], [], []>} : vector<16x32xf32>, vector<32x32xf32>, vector<16x32xf32> -> vector<16x32xf32>
    %368 = vector.broadcast %2 : vector<1x32xf32> to vector<16x32xf32>
    %369 = arith.addf %367, %368 : vector<16x32xf32>
    %370 = math.tanh %369 : vector<16x32xf32>
    %c0_131 = arith.constant 0 : index
    %c0_132 = arith.constant 0 : index
    %371 = vector.load %arg8[%c0_131, %c0_132] : memref<16x32xf32, #tpu.memory_space<vmem>>, vector<16x32xf32>
    tpu.vector_store %arg8[%c0_131, %c0_132], %370 {strides = array<i32>} : memref<16x32xf32, #tpu.memory_space<vmem>>, vector<16x32xf32>,
    return
  }
}

</mosaic_0001>

<bundles_post_ra>
// kernel: bert_embedder_forward.1
= control target key start
LH: loop header
LB: loop body
LE: loop exit
PB: predicated region body
PF: predicated region fallthrough
CT: control target
= control target key end

     0   :  { %vm34_vm0 = vcmask 261120   ;;  %v85_v32 = vlaneseq  ;;  %vm176_vm1 = vcmask 64512   ;;  %s3763_s18 = smov 96   ;;  %s3764_s19 = smov 88   ;;  %vm264_vm3 = vcmask 130048   ;;  %s4296_s0 = inlined_call_operand.vmem [shape: f32[16,32], index: 0, kind: input, shape index: {}]   ;;  %s4297_s3 = inlined_call_operand.vmem [shape: bf16[2,32,128], index: 3, kind: input, shape index: {}]   ;;  %s4298_s2 = inlined_call_operand.vmem [shape: f32[3,32], index: 2, kind: input, shape index: {}]   ;;  %s4299_s6 = inlined_call_operand.vmem [shape: f32[2,8,96], index: 6, kind: input, shape index: {}]   ;;  %s4300_s1 = inlined_call_operand.vmem [shape: f32[16,16], index: 1, kind: input, shape index: {}]   ;;  %s4301_s4 = inlined_call_operand.vmem [shape: bf16[2,32,64], index: 4, kind: input, shape index: {}]   ;;  %s4302_s5 = inlined_call_operand.vmem [shape: bf16[2,64,32], index: 5, kind: input, shape index: {}]   ;;  %s4303_s7 = inlined_call_operand.vmem [shape: bf16[32,32], index: 7, kind: input, shape index: {}]   ;;  %s4304_s8 = inlined_call_operand.vmem [shape: f32[16,32], index: 8, kind: output, shape index: {}]  }
   0x1   :  { %v32_v0 = vld [vmem:[%s4296_s0] sm:$0xff]  ;;  %v33_v1 = vld [vmem:[%s4296_s0 + $0x8] sm:$0xff]  ;;  %s3765_s20 = smov 120   ;;  %vm3892_vm2 = vmpackc.low %vm176_vm1, %vm176_vm1  ;;  %s3766_s25 = smov 64   ;;  %vm588_vm4 = vcmask 130112   ;;  %vm803_vm5 = vcmask 195712  }
   0x2   :  { %v35_v2 = vsel %vm34_vm0, %v32_v0, 0.0  ;;  %v38_v3 = vsel %vm34_vm0, %v33_v1, 0.0  ;;  %v3836_v14 = vld [vmem:[%s4297_s3] sm:$0xff]   ;;  %v3841_v15 = vld [vmem:[%s4297_s3 + $0x8] sm:$0xff]   ;;  %v3861_v33 = vshrl.u32 %v85_v32, 7  ;;  %s3767_s26 = smov 56  }
   0x3   :  { %36 = vadd.xlane.f32.xlu0 %v35_v2  ;;  %3383 = vmatprep.subr.bf16.mxu0 %v3836_v14  ;;  %v2857_v23 = vld [vmem:[%s4298_s2] ss:$0 sm:$0xff]  ;;  %v2858_v25 = vld [vmem:[%s4298_s2 + $0x1] ss:$0 sm:$0xff]  ;;  %v3910_v52 = vld [vmem:[%s4300_s1 + $0x8] sm:$0xff]  ;;  %s3768_s27 = smov 112  }
   0x4   :  { %3385 = vmatpush3.bf16.msra.mxu0 %v3836_v14  ;;  %v87_v34 = vsub.s32 0, %v3861_v33  ;;  %v3867_v35 = vld [vmem:[%s4299_s6] sm:$0xff]  ;;  %s3769_s28 = smov 80   ;;  %s3770_s29 = smov 48   ;;  %vm1018_vm6 = vcmask 261312   ;;  %vm1295_vm7 = vcmask 523264  }
   0x5   :  { %3387 = vmatprep.subr.bf16.mxu0 %v3841_v15  ;;  %v3905_v49 = vld [vmem:[%s4300_s1] sm:$0xff]  ;;  %s3771_s30 = smov 104   ;;  %s3772_s0 = smov 72  }
   0x6   :  { %v88_v36 = vrot.slane %v3867_v35, %v87_v34  ;;  %s3773_s9 = smov 40   ;;  %s3774_s10 = smov 8  }
   0x7   :  { %39 = vadd.xlane.f32.xlu0 %v38_v3  ;;  %s3775_s11 = smov 16   ;;  %s3776_s12 = smov 32  }
   0x8   :  { %3389 = vmatpush3.bf16.msra.mxu0 %v3841_v15  ;;  %s3777_s13 = smov 24  }
  0x90   :  { %v37_v4 = vpop.xlane.xlu0 %36 }
  0x91   :  { %v42_v5 = vmul.f32 0.03125, %v37_v4 }
  0x93   :  { %v44_v6 = vsub.f32 %v32_v0, %v42_v5 }
  0x94   :  { %v40_v7 = vpop.xlane.xlu0 %39 }
  0x95   :  { %v43_v8 = vmul.f32 0.03125, %v40_v7  ;;  %v46_v9 = vmul.f32 %v44_v6, %v44_v6 }
  0x97   :  { %v45_v10 = vsub.f32 %v33_v1, %v43_v8  ;;  %v48_v11 = vsel %vm34_vm0, %v46_v9, 0.0 }
  0x98   :  { %49 = vadd.xlane.f32.xlu1 %v48_v11 }
  0x99   :  { %v47_v12 = vmul.f32 %v45_v10, %v45_v10 }
  0x9b   :  { %v51_v13 = vsel %vm34_vm0, %v47_v12, 0.0 }
  0x9c   :  { %52 = vadd.xlane.f32.xlu1 %v51_v13 }
 0x125   :  { %v50_v16 = vpop.xlane.xlu1 %49 }
 0x126   :  { %v54_v17 = vmul.f32 0.03125, %v50_v16 }
 0x128   :  { %v56_v18 = vadd.f32 1e-12, %v54_v17 }
 0x129   :  { %v53_v19 = vpop.xlane.xlu1 %52 }
 0x12a   :  { %3665 = vrsqrt.f32 %v56_v18  ;;  %v55_v20 = vmul.f32 0.03125, %v53_v19 }
 0x12c   :  { %v57_v21 = vadd.f32 1e-12, %v55_v20 }
 0x12e   :  { %3667 = vrsqrt.f32 %v57_v21 }
 0x134   :  { %v3666_v22 = vpop.eup %3665 }
 0x135   :  { %v60_v24 = vmul.f32 %v3666_v22, %v44_v6 }
 0x137   :  { %v66_v26 = vmul.f32 %v2857_v23, %v60_v24 }
 0x138   :  { %v3668_v27 = vpop.eup %3667 }
 0x139   :  { %v61_v28 = vmul.f32 %v3668_v27, %v45_v10  ;;  %v3853_v29 = vadd.f32 %v2858_v25, %v66_v26 }
 0x13b   :  { %v67_v30 = vmul.f32 %v2857_v23, %v61_v28  ;;  %3163 = vmatprep.mubr.msk.f32.mxu0 %vm34_vm0, %v3853_v29 }
 0x13d   :  { %v3857_v31 = vadd.f32 %v2858_v25, %v67_v30 }
 0x13f   :  { %3164 = vmatmul.mubr.msk.f32.vlgmr.msra.gmra.mrb[0].mxu0 %vm34_vm0, %v3857_v31 }
 0x212   :  { %v3165_v37 = vpop.f32.mrb[0].mxu0 }
 0x213   :  { %v3872_v38 = vadd.f32 %v3165_v37, %v88_v36  ;;  %v161_v39 = vpop.f32.mrb[1].mxu0 }
 0x214   :  { %v3874_v40 = vadd.f32 %v161_v39, %v88_v36 }
 0x216   :  { %3170 = vmatprep.mubr.msk.f32.mxu1 %vm176_vm1, %v3874_v40  ;;  %v3880_v41 = vpack.i.bf16 %v3872_v38, %v3874_v40 }
 0x218   :  { %3566 = vrot.lane.b32.xlu0 %v3880_v41, %s3763_s18 }
 0x21c   :  { %3576 = vrot.lane.b32.xlu0 %v3880_v41, %s3764_s19 }
 0x220   :  { %376 = vrot.lane.b32.xlu0 %v3874_v40, %s3765_s20 }
 0x224   :  { %378 = vrot.lane.b32.xlu0 %v3872_v38, %s3765_s20 }
 0x28a   :  { %v3567_v42 = vpop.permute.xlu0 %3566 }
 0x28b   :  { %v3569_v43 = vunpack.i.h.bf16 %v3567_v42  ;;  %v3568_v44 = vunpack.i.l.bf16 %v3567_v42 }
 0x28d   :  { %v3390_v46 = vpack.c.bf16 %v3569_v43, %v3568_v44 }
 0x28e   :  { %v3577_v5 = vpop.permute.xlu0 %3576 }
 0x28f   :  { %3392 = vmatprep.subr.msk.bf16.mxu1 %vm3892_vm2, %v3390_v46  ;;  %v3579_v7 = vunpack.i.h.bf16 %v3577_v5  ;;  %v3578_v8 = vunpack.i.l.bf16 %v3577_v5 }
 0x290   :  { %3395 = vmatpush3.bf16.xpose.msk.msra.mxu1 %vm3892_vm2, %v3390_v46 }
 0x291   :  { %v3400_v12 = vpack.c.bf16 %v3579_v7, %v3578_v8 }
 0x292   :  { %v377_v19 = vpop.permute.xlu0 %376 }
 0x296   :  { %v379_v20 = vpop.permute.xlu0 %378 }
 0x297   :  { %3171 = vmatmul.mubr.msk.f32.vlgmr.msra.gmra.mrb[0].mxu1 %vm176_vm1, %v3872_v38 }
 0x36a   :  { %v3172_v47 = vpop.f32.mrb[0].mxu1 }
 0x36b   :  { %v251_v48 = vpop.f32.mrb[1].mxu1  ;;  %v261_v50 = vmul.f32 0.35355338, %v3172_v47 }
 0x36c   :  { %v260_v51 = vmul.f32 0.35355338, %v251_v48 }
 0x36d   :  { %v263_v55 = vadd.f32 %v261_v50, %v3910_v52 }
 0x36e   :  { %v262_v53 = vadd.f32 %v260_v51, %v3905_v49 }
 0x36f   :  { %v268_v56 = vsel %vm264_vm3, %v263_v55, -inf }
 0x370   :  { %v265_v54 = vsel %vm264_vm3, %v262_v53, -inf }
 0x371   :  { %266 = vmax.xlane.f32.xlu1 %v265_v54 }
 0x375   :  { %269 = vmax.xlane.f32.xlu1 %v268_v56 }
 0x3fe   :  { %v267_v57 = vpop.xlane.xlu1 %266 }
 0x3ff   :  { %v271_v58 = vsub.f32 %v262_v53, %v267_v57 }
 0x401   :  { %v273_v61 = vmul.f32 1.442695, %v271_v58 }
 0x402   :  { %v270_v59 = vpop.xlane.xlu1 %269 }
 0x403   :  { %v272_v60 = vsub.f32 %v263_v55, %v270_v59 }
 0x405   :  { %v275_v62 = vmul.f32 1.442695, %v272_v60 }
 0x407   :  { %3669 = vpow2.f32 %v275_v62 }
 0x408   :  { %3671 = vpow2.f32 %v273_v61 }
 0x411   :  { %v3670_v63 = vpop.eup %3669 }
 0x412   :  { %v280_v0 = vsel %vm264_vm3, %v3670_v63, 0.0  ;;  %v3672_v1 = vpop.eup %3671 }
 0x413   :  { %281 = vadd.xlane.f32.xlu1 %v280_v0  ;;  %v277_v2 = vsel %vm264_vm3, %v3672_v1, 0.0 }
 0x417   :  { %278 = vadd.xlane.f32.xlu1 %v277_v2 }
 0x428   :  { %3571 = vrot.lane.b32.xlu1 %v3880_v41, %s3766_s25 }
 0x4a0   :  { %v282_v3 = vpop.xlane.xlu1 %281 }
 0x4a1   :  { %3673 = vrcp.f32 %v282_v3 }
 0x4a4   :  { %v279_v4 = vpop.xlane.xlu1 %278 }
 0x4a5   :  { %3675 = vrcp.f32 %v279_v4 }
 0x4a8   :  { %v3572_v6 = vpop.permute.xlu1 %3571 }
 0x4a9   :  { %v3574_v9 = vunpack.i.h.bf16 %v3572_v6  ;;  %v3573_v10 = vunpack.i.l.bf16 %v3572_v6 }
 0x4ab   :  { %v3396_v11 = vpack.c.bf16 %v3574_v9, %v3573_v10  ;;  %v3674_v13 = vpop.eup %3673 }
 0x4ac   :  { %v286_v18 = vmul.f32 %v3674_v13, %v3670_v63 }
 0x4ad   :  { %3397 = vmatprep.subr.bf16.mxu1 %v3396_v11 }
 0x4ae   :  { %3399 = vmatpush3.bf16.msra.mxu1 %v3396_v11 }
 0x4af   :  { %v3676_v16 = vpop.eup %3675  ;;  %3402 = vmatprep.subr.msk.bf16.mxu1 %vm3892_vm2, %v3400_v12 }
 0x4b0   :  { %v285_v17 = vmul.f32 %v3676_v16, %v3672_v1 }
 0x4b2   :  { %3177 = vmatprep.mubr.msk.f32.mxu1 %vm264_vm3, %v285_v17 }
 0x4b3   :  { %3178 = vmatmul.mubr.msk.f32.vlgmr.msra.gmra.mrb[2].mxu1 %vm264_vm3, %v286_v18 }
 0x4b4   :  { %3184 = vmatprep.mubr.msk.f32.mxu1 %vm176_vm1, %v377_v19 }
 0x4b7   :  { %3405 = vmatpush3.bf16.xpose.msk.msra.mxu1 %vm3892_vm2, %v3400_v12 }
 0x4be   :  { %3185 = vmatmul.mubr.msk.f32.vlgmr.msra.gmra.mrb[4].mxu1 %vm176_vm1, %v379_v20 }
 0x586   :  { %v3179_v21 = vpop.f32.mrb[2].mxu1 }
 0x587   :  { %375 = vst.msk [vmem:[#allocation2 + $0x8] sm:$0xff] %vm176_vm1, %v3179_v21  ;;  %v365_v22 = vpop.f32.mrb[3].mxu1 }
 0x588   :  { %374 = vst.msk [vmem:[#allocation2] sm:$0xff] %vm176_vm1, %v365_v22 }
 0x591   :  { %v3186_v23 = vpop.f32.mrb[4].mxu1 }
 0x592   :  { %v468_v24 = vmul.f32 0.35355338, %v3186_v23  ;;  %v458_v25 = vpop.f32.mrb[5].mxu1 }
 0x593   :  { %v467_v26 = vmul.f32 0.35355338, %v458_v25 }
 0x594   :  { %v470_v27 = vadd.f32 %v468_v24, %v3910_v52 }
 0x595   :  { %v469_v28 = vadd.f32 %v467_v26, %v3905_v49 }
 0x596   :  { %v474_v30 = vsel %vm264_vm3, %v470_v27, -inf }
 0x597   :  { %475 = vmax.xlane.f32.xlu0 %v474_v30  ;;  %v471_v32 = vsel %vm264_vm3, %v469_v28, -inf }
 0x598   :  { %472 = vmax.xlane.f32.xlu1 %v471_v32 }
 0x5a9   :  { %3581 = vrot.lane.b32.xlu1 %v3880_v41, %s3767_s26 }
 0x5ad   :  { %591 = vrot.lane.b32.xlu1 %v3874_v40, %s3768_s27 }
 0x5b1   :  { %593 = vrot.lane.b32.xlu1 %v3872_v38, %s3768_s27 }
 0x624   :  { %v476_v36 = vpop.xlane.xlu0 %475 }
 0x625   :  { %v478_v37 = vsub.f32 %v470_v27, %v476_v36  ;;  %v473_v39 = vpop.xlane.xlu1 %472 }
 0x626   :  { %v477_v42 = vsub.f32 %v469_v28, %v473_v39 }
 0x627   :  { %v481_v43 = vmul.f32 1.442695, %v478_v37 }
 0x628   :  { %v479_v44 = vmul.f32 1.442695, %v477_v42 }
 0x629   :  { %3677 = vpow2.f32 %v481_v43  ;;  %v3582_v46 = vpop.permute.xlu1 %3581 }
 0x62a   :  { %v3584_v47 = vunpack.i.h.bf16 %v3582_v46  ;;  %v3583_v48 = vunpack.i.l.bf16 %v3582_v46  ;;  %3679 = vpow2.f32 %v479_v44 }
 0x62c   :  { %v3406_v50 = vpack.c.bf16 %v3584_v47, %v3583_v48 }
 0x62d   :  { %v592_v2 = vpop.permute.xlu1 %591 }
 0x62e   :  { %3407 = vmatprep.subr.bf16.mxu0 %v3406_v50 }
 0x62f   :  { %3409 = vmatpush3.bf16.msra.mxu0 %v3406_v50 }
 0x631   :  { %v594_v3 = vpop.permute.xlu1 %593 }
 0x633   :  { %v3678_v51 = vpop.eup %3677 }
 0x634   :  { %v486_v53 = vsel %vm264_vm3, %v3678_v51, 0.0  ;;  %v3680_v54 = vpop.eup %3679 }
 0x635   :  { %487 = vadd.xlane.f32.xlu0 %v486_v53  ;;  %v483_v55 = vsel %vm264_vm3, %v3680_v54, 0.0 }
 0x639   :  { %484 = vadd.xlane.f32.xlu0 %v483_v55 }
 0x64f   :  { %3586 = vrot.lane.b32.xlu0 %v3880_v41, %s3769_s28 }
 0x6c2   :  { %v488_v56 = vpop.xlane.xlu0 %487 }
 0x6c3   :  { %3681 = vrcp.f32 %v488_v56 }
 0x6c6   :  { %v485_v57 = vpop.xlane.xlu0 %484 }
 0x6c7   :  { %3683 = vrcp.f32 %v485_v57 }
 0x6ca   :  { %v3587_v58 = vpop.permute.xlu0 %3586 }
 0x6cb   :  { %v3589_v59 = vunpack.i.h.bf16 %v3587_v58  ;;  %v3588_v60 = vunpack.i.l.bf16 %v3587_v58 }
 0x6cd   :  { %v3410_v61 = vpack.c.bf16 %v3589_v59, %v3588_v60  ;;  %v3682_v62 = vpop.eup %3681 }
 0x6ce   :  { %v492_v1 = vmul.f32 %v3682_v62, %v3678_v51 }
 0x6cf   :  { %3412 = vmatprep.subr.msk.bf16.mxu0 %vm3892_vm2, %v3410_v61 }
 0x6d1   :  { %v3684_v63 = vpop.eup %3683 }
 0x6d2   :  { %v491_v0 = vmul.f32 %v3684_v63, %v3680_v54 }
 0x6d4   :  { %3191 = vmatprep.mubr.msk.f32.mxu0 %vm264_vm3, %v491_v0 }
 0x6d5   :  { %3192 = vmatmul.mubr.msk.f32.vlgmr.msra.gmra.mrb[2].mxu0 %vm264_vm3, %v492_v1 }
 0x6d6   :  { %3415 = vmatpush3.bf16.xpose.msk.msra.mxu0 %vm3892_vm2, %v3410_v61  ;;  %3198 = vmatprep.mubr.msk.f32.mxu0 %vm176_vm1, %v592_v2 }
 0x6dd   :  { %3199 = vmatmul.mubr.msk.f32.vlgmr.msra.gmra.mrb[4].mxu0 %vm176_vm1, %v594_v3 }
 0x7a8   :  { %v3952_v4 = vpop.f32.mrb[2].mxu0 }
 0x7a9   :  { %v3954_v5 = vpop.f32.mrb[3].mxu0 }
 0x7b0   :  { %v3200_v6 = vpop.f32.mrb[4].mxu0 }
 0x7b1   :  { %v683_v7 = vmul.f32 0.35355338, %v3200_v6  ;;  %v673_v8 = vpop.f32.mrb[5].mxu0 }
 0x7b2   :  { %v682_v9 = vmul.f32 0.35355338, %v673_v8 }
 0x7b3   :  { %v685_v10 = vadd.f32 %v683_v7, %v3910_v52 }
 0x7b4   :  { %v684_v11 = vadd.f32 %v682_v9, %v3905_v49 }
 0x7b5   :  { %v689_v12 = vsel %vm264_vm3, %v685_v10, -inf }
 0x7b6   :  { %690 = vmax.xlane.f32.xlu0 %v689_v12  ;;  %v686_v13 = vsel %vm264_vm3, %v684_v11, -inf  ;;  %v2945_v12 = vunpack.c.l.bf16 %v3836_v14 }
 0x7b7   :  { %687 = vmax.xlane.f32.xlu1 %v686_v13  ;;  %v2946_v13 = vunpack.c.h.bf16 %v3836_v14 }
 0x7c8   :  { %3591 = vrot.lane.b32.xlu1 %v3880_v41, %s3770_s29 }
 0x7cc   :  { %806 = vrot.lane.b32.xlu1 %v3874_v40, %s3771_s30 }
 0x7d0   :  { %808 = vrot.lane.b32.xlu1 %v3872_v38, %s3771_s30 }
 0x843   :  { %v691_v16 = vpop.xlane.xlu0 %690 }
 0x844   :  { %v693_v17 = vsub.f32 %v685_v10, %v691_v16  ;;  %v688_v18 = vpop.xlane.xlu1 %687  ;;  %v3605_v16 = vpack.i.bf16 %v2946_v13, %v2945_v12  ;;  %v1160_v12 = vsub.s32 5, %v3861_v33 }
 0x845   :  { %v692_v19 = vsub.f32 %v684_v11, %v688_v18 }
 0x846   :  { %v696_v20 = vmul.f32 1.442695, %v693_v17 }
 0x847   :  { %v694_v21 = vmul.f32 1.442695, %v692_v19 }
 0x848   :  { %3685 = vpow2.f32 %v696_v20  ;;  %v3592_v22 = vpop.permute.xlu1 %3591 }
 0x849   :  { %v3594_v23 = vunpack.i.h.bf16 %v3592_v22  ;;  %v3593_v24 = vunpack.i.l.bf16 %v3592_v22  ;;  %3687 = vpow2.f32 %v694_v21 }
 0x84b   :  { %v3416_v25 = vpack.c.bf16 %v3594_v23, %v3593_v24 }
 0x84c   :  { %v807_v47 = vpop.permute.xlu1 %806 }
 0x84d   :  { %3417 = vmatprep.subr.bf16.mxu1 %v3416_v25 }
 0x84e   :  { %3419 = vmatpush3.bf16.msra.mxu1 %v3416_v25 }
 0x850   :  { %v809_v48 = vpop.permute.xlu1 %808 }
 0x852   :  { %v3686_v26 = vpop.eup %3685 }
 0x853   :  { %v701_v40 = vsel %vm264_vm3, %v3686_v26, 0.0  ;;  %v3688_v27 = vpop.eup %3687 }
 0x854   :  { %702 = vadd.xlane.f32.xlu0 %v701_v40  ;;  %v698_v38 = vsel %vm264_vm3, %v3688_v27, 0.0 }
 0x858   :  { %699 = vadd.xlane.f32.xlu0 %v698_v38  ;;  %v2950_v38 = vunpack.c.h.bf16 %v3841_v15 }
 0x86e   :  { %3596 = vrot.lane.b32.xlu0 %v3880_v41, %s3772_s0 }
 0x8e1   :  { %v703_v28 = vpop.xlane.xlu0 %702 }
 0x8e2   :  { %3689 = vrcp.f32 %v703_v28 }
 0x8e5   :  { %v700_v30 = vpop.xlane.xlu0 %699 }
 0x8e6   :  { %3691 = vrcp.f32 %v700_v30 }
 0x8e9   :  { %v3597_v32 = vpop.permute.xlu0 %3596 }
 0x8ea   :  { %v3599_v36 = vunpack.i.h.bf16 %v3597_v32  ;;  %v3598_v37 = vunpack.i.l.bf16 %v3597_v32 }
 0x8ec   :  { %v3420_v39 = vpack.c.bf16 %v3599_v36, %v3598_v37  ;;  %v3690_v42 = vpop.eup %3689 }
 0x8ed   :  { %v707_v46 = vmul.f32 %v3690_v42, %v3686_v26 }
 0x8ee   :  { %3422 = vmatprep.subr.msk.bf16.mxu1 %vm3892_vm2, %v3420_v39 }
 0x8f0   :  { %v3692_v43 = vpop.eup %3691 }
 0x8f1   :  { %v706_v44 = vmul.f32 %v3692_v43, %v3688_v27  ;;  %v2949_v27 = vunpack.c.l.bf16 %v3841_v15 }
 0x8f3   :  { %3205 = vmatprep.mubr.msk.f32.mxu1 %vm264_vm3, %v706_v44  ;;  %v3610_v32 = vpack.i.bf16 %v2950_v38, %v2949_v27 }
 0x8f4   :  { %3206 = vmatmul.mubr.msk.f32.vlgmr.msra.gmra.mrb[6].mxu1 %vm264_vm3, %v707_v46 }
 0x8f5   :  { %3425 = vmatpush3.bf16.xpose.msk.msra.mxu1 %vm3892_vm2, %v3420_v39  ;;  %3212 = vmatprep.mubr.msk.f32.mxu1 %vm176_vm1, %v807_v47  ;;  %v1025_v47 = vsub.s32 1, %v3861_v33 }
 0x8fc   :  { %3213 = vmatmul.mubr.msk.f32.vlgmr.msra.gmra.mrb[8].mxu1 %vm176_vm1, %v809_v48  ;;  %v1026_v48 = vrot.slane %v3867_v35, %v1025_v47 }
 0x9c7   :  { %v3207_v50 = vpop.f32.mrb[6].mxu1 }
 0x9c8   :  { %v786_v51 = vpop.f32.mrb[7].mxu1 }
 0x9cf   :  { %v3214_v53 = vpop.f32.mrb[8].mxu1 }
 0x9d0   :  { %v898_v54 = vmul.f32 0.35355338, %v3214_v53  ;;  %v888_v55 = vpop.f32.mrb[9].mxu1 }
 0x9d1   :  { %v897_v56 = vmul.f32 0.35355338, %v888_v55 }
 0x9d2   :  { %v900_v57 = vadd.f32 %v898_v54, %v3910_v52 }
 0x9d3   :  { %v899_v58 = vadd.f32 %v897_v56, %v3905_v49 }
 0x9d4   :  { %v904_v59 = vsel %vm264_vm3, %v900_v57, -inf }
 0x9d5   :  { %905 = vmax.xlane.f32.xlu0 %v904_v59  ;;  %v901_v60 = vsel %vm264_vm3, %v899_v58, -inf }
 0x9d6   :  { %902 = vmax.xlane.f32.xlu1 %v901_v60 }
 0x9e7   :  { %3601 = vrot.lane.b32.xlu1 %v3880_v41, %s3773_s9 }
 0x9eb   :  { %584 = vrot.lane.b32.xlu1 %v3952_v4, %s3774_s10 }
 0x9ef   :  { %797 = vrot.lane.b32.xlu1 %v786_v51, %s3775_s11 }
 0x9f3   :  { %3606 = vrot.lane.b32.xlu1 %v3605_v16, %s3776_s12 }
 0xa62   :  { %v906_v61 = vpop.xlane.xlu0 %905 }
 0xa63   :  { %v908_v62 = vsub.f32 %v900_v57, %v906_v61  ;;  %v903_v63 = vpop.xlane.xlu1 %902 }
 0xa64   :  { %v907_v0 = vsub.f32 %v899_v58, %v903_v63 }
 0xa65   :  { %v911_v1 = vmul.f32 1.442695, %v908_v62 }
 0xa66   :  { %v909_v2 = vmul.f32 1.442695, %v907_v0 }
 0xa67   :  { %v3602_v3 = vpop.permute.xlu1 %3601 }
 0xa68   :  { %3693 = vpow2.f32 %v909_v2  ;;  %v3604_v6 = vunpack.i.h.bf16 %v3602_v3  ;;  %v3603_v7 = vunpack.i.l.bf16 %v3602_v3 }
 0xa69   :  { %3695 = vpow2.f32 %v911_v1 }
 0xa6a   :  { %v3426_v41 = vpack.c.bf16 %v3604_v6, %v3603_v7  ;;  %v3016_v6 = vld [vmem:[%s4301_s4 + $0x8] sm:$0xff]  }
 0xa6b   :  { %v585_v8 = vpop.permute.xlu1 %584 }
 0xa6c   :  { %590 = vst.msk [vmem:[#allocation2 + $0x8] sm:$0xff] %vm588_vm4, %v585_v8  ;;  %3427 = vmatprep.subr.bf16.mxu0 %v3426_v41 }
 0xa6d   :  { %3429 = vmatpush3.bf16.msra.mxu0 %v3426_v41 }
 0xa6f   :  { %v798_v20 = vpop.permute.xlu1 %797 }
 0xa72   :  { %v3694_v4 = vpop.eup %3693 }
 0xa73   :  { %v913_v9 = vsel %vm264_vm3, %v3694_v4, 0.0  ;;  %v3696_v10 = vpop.eup %3695  ;;  %v3607_v24 = vpop.permute.xlu1 %3606 }
 0xa74   :  { %914 = vadd.xlane.f32.xlu0 %v913_v9  ;;  %v916_v11 = vsel %vm264_vm3, %v3696_v10, 0.0  ;;  %v3609_v25 = vunpack.i.h.bf16 %v3607_v24  ;;  %v3608_v26 = vunpack.i.l.bf16 %v3607_v24  ;;  %v3017_v24 = vld [vmem:[%s4302_s5 + $0x8] sm:$0xff]  }
 0xa76   :  { %v3430_v40 = vpack.c.bf16 %v3609_v25, %v3608_v26  ;;  %v3018_v25 = vld [vmem:[%s4302_s5 + $0x10] sm:$0xff]   ;;  %v3019_v26 = vld [vmem:[%s4302_s5 + $0x18] sm:$0xff]  }
 0xa78   :  { %917 = vadd.xlane.f32.xlu0 %v916_v11  ;;  %3431 = vmatprep.subr.bf16.mxu0 %v3430_v40  ;;  %v1154_v11 = vsub.s32 4, %v3861_v33 }
 0xa7a   :  { %v1155_v13 = vrot.slane %v3867_v35, %v1154_v11 }
 0xa8e   :  { %582 = vrot.lane.b32.xlu0 %v3954_v5, %s3774_s10 }
 0xa92   :  { %799 = vrot.lane.b32.xlu0 %v3207_v50, %s3775_s11 }
 0xb01   :  { %v915_v17 = vpop.xlane.xlu0 %914 }
 0xb02   :  { %3697 = vrcp.f32 %v915_v17 }
 0xb05   :  { %v918_v18 = vpop.xlane.xlu0 %917 }
 0xb06   :  { %3699 = vrcp.f32 %v918_v18  ;;  %v1161_v18 = vrot.slane %v3867_v35, %v1160_v12 }
 0xb09   :  { %v583_v19 = vpop.permute.xlu0 %582 }
 0xb0a   :  { %589 = vst.msk [vmem:[#allocation2] sm:$0xff] %vm588_vm4, %v583_v19 }
 0xb0b   :  { %804 = vst.msk [vmem:[#allocation2] sm:$0xff] %vm803_vm5, %v798_v20 }
 0xb0c   :  { %v3698_v5 = vpop.eup %3697 }
 0xb0d   :  { %v800_v21 = vpop.permute.xlu0 %799  ;;  %v921_v22 = vmul.f32 %v3698_v5, %v3694_v4 }
 0xb0e   :  { %805 = vst.msk [vmem:[#allocation2 + $0x8] sm:$0xff] %vm803_vm5, %v800_v21 }
 0xb0f   :  { %3219 = vmatprep.mubr.msk.f32.mxu0 %vm264_vm3, %v921_v22 }
 0xb10   :  { %v3700_v14 = vpop.eup %3699 }
 0xb11   :  { %v922_v23 = vmul.f32 %v3700_v14, %v3696_v10 }
 0xb13   :  { %3220 = vmatmul.mubr.msk.f32.vlgmr.msra.gmra.mrb[6].mxu0 %vm264_vm3, %v922_v23  ;;  %v2960_v23 = vld [vmem:[%s4302_s5] sm:$0xff]  }
 0xb14   :  { %3433 = vmatpush3.bf16.msra.mxu0 %v3430_v40  ;;  %v1174_v40 = vsub.s32 2, %v3861_v33 }
 0xb16   :  { %v1175_v27 = vrot.slane %v3867_v35, %v1174_v40 }
 0xbe6   :  { %v3221_v28 = vpop.f32.mrb[6].mxu0 }
 0xbe7   :  { %1014 = vrot.lane.b32.xlu0 %v3221_v28, %s3777_s13  ;;  %v1001_v30 = vpop.f32.mrb[7].mxu0 }
 0xbe8   :  { %1012 = vrot.lane.b32.xlu1 %v1001_v30, %s3777_s13 }
 0xbec   :  { %3611 = vrot.lane.b32.xlu1 %v3610_v32, %s3776_s12 }
 0xc59   :  { %v1015_v36 = vpop.permute.xlu0 %1014 }
 0xc5a   :  { %1020 = vst.msk [vmem:[#allocation2 + $0x8] sm:$0xff] %vm1018_vm6, %v1015_v36  ;;  %v1013_v37 = vpop.permute.xlu1 %1012 }
 0xc5b   :  { %1019 = vst.msk [vmem:[#allocation2] sm:$0xff] %vm1018_vm6, %v1013_v37 }
 0xc5e   :  { %v3612_v39 = vpop.permute.xlu1 %3611 }
 0xc5f   :  { %v3614_v42 = vunpack.i.h.bf16 %v3612_v39  ;;  %v3613_v15 = vunpack.i.l.bf16 %v3612_v39 }
 0xc61   :  { %v3434_v43 = vpack.c.bf16 %v3614_v42, %v3613_v15  ;;  %v1022_v46 = vld [vmem:[#allocation2 + $0x8] sm:$0xff] }
 0xc62   :  { %v1021_v44 = vld [vmem:[#allocation2] sm:$0xff] }
 0xc63   :  { %3435 = vmatprep.subr.bf16.mxu0 %v3434_v43  ;;  %3230 = vmatprep.mubr.msk.f32.mxu0 %vm34_vm0, %v1021_v44 }
 0xc64   :  { %3437 = vmatpush3.bf16.msra.mxu0 %v3434_v43 }
 0xc65   :  { %3447 = vmatprep.subr.bf16.mxu0 %v2960_v23 }
 0xc67   :  { %3231 = vmatmul.mubr.msk.f32.vlgmr.msra.gmra.mrb[8].mxu0 %vm34_vm0, %v1022_v46 }
 0xc68   :  { %3449 = vmatpush3.bf16.msra.mxu0 %v2960_v23 }
 0xc69   :  { %3451 = vmatprep.subr.bf16.mxu0 %v3017_v24 }
 0xc6c   :  { %3453 = vmatpush3.bf16.msra.mxu0 %v3017_v24  ;;  %v1407_v24 = vsub.s32 6, %v3861_v33 }
 0xc6d   :  { %3455 = vmatprep.subr.bf16.mxu0 %v3018_v25 }
 0xc70   :  { %3457 = vmatpush3.bf16.msra.mxu0 %v3018_v25  ;;  %v1413_v25 = vsub.s32 7, %v3861_v33 }
 0xc71   :  { %3459 = vmatprep.subr.bf16.mxu0 %v3019_v26 }
 0xc74   :  { %3461 = vmatpush3.bf16.msra.mxu0 %v3019_v26  ;;  %v1408_v26 = vrot.slane %v3867_v35, %v1407_v24 }
 0xd3a   :  { %v3232_v50 = vpop.f32.mrb[8].mxu0 }
 0xd3b   :  { %v1121_v51 = vadd.f32 %v3232_v50, %v1026_v48  ;;  %v1115_v53 = vpop.f32.mrb[9].mxu0 }
 0xd3c   :  { %v1116_v54 = vadd.f32 %v1115_v53, %v1026_v48 }
 0xd3d   :  { %v1125_v55 = vadd.f32 %v1121_v51, %v3857_v31 }
 0xd3e   :  { %v1124_v56 = vadd.f32 %v1116_v54, %v3853_v29  ;;  %v2952_v29 = vld [vmem:[%s4301_s4] sm:$0xff]  }
 0xd3f   :  { %v1129_v57 = vsel %vm34_vm0, %v1125_v55, 0.0  ;;  %3439 = vmatprep.subr.bf16.mxu1 %v2952_v29 }
 0xd40   :  { %1130 = vadd.xlane.f32.xlu1 %v1129_v57  ;;  %v1126_v58 = vsel %vm34_vm0, %v1124_v56, 0.0  ;;  %3441 = vmatpush3.bf16.msra.mxu1 %v2952_v29 }
 0xd41   :  { %1127 = vadd.xlane.f32.xlu0 %v1126_v58  ;;  %3443 = vmatprep.subr.bf16.mxu1 %v3016_v6 }
 0xd44   :  { %3445 = vmatpush3.bf16.msra.mxu1 %v3016_v6 }
 0xdcd   :  { %v1131_v59 = vpop.xlane.xlu1 %1130 }
 0xdce   :  { %v1133_v60 = vmul.f32 0.03125, %v1131_v59  ;;  %v1128_v61 = vpop.xlane.xlu0 %1127 }
 0xdcf   :  { %v1132_v62 = vmul.f32 0.03125, %v1128_v61 }
 0xdd0   :  { %v1135_v63 = vsub.f32 %v1125_v55, %v1133_v60  ;;  %v1293_v60 = vsub.s32 3, %v3861_v33 }
 0xdd1   :  { %v1134_v0 = vsub.f32 %v1124_v56, %v1132_v62 }
 0xdd2   :  { %v1137_v3 = vmul.f32 %v1135_v63, %v1135_v63  ;;  %v1294_v61 = vrot.slane %v3867_v35, %v1293_v60 }
 0xdd3   :  { %v1136_v1 = vmul.f32 %v1134_v0, %v1134_v0 }
 0xdd4   :  { %v1141_v31 = vsel %vm34_vm0, %v1137_v3, 0.0 }
 0xdd5   :  { %v1138_v2 = vsel %vm34_vm0, %v1136_v1, 0.0 }
 0xdd6   :  { %1139 = vadd.xlane.f32.xlu0 %v1138_v2 }
 0xdda   :  { %1142 = vadd.xlane.f32.xlu0 %v1141_v31 }
 0xe63   :  { %v1140_v7 = vpop.xlane.xlu0 %1139 }
 0xe64   :  { %v1144_v41 = vmul.f32 0.03125, %v1140_v7 }
 0xe66   :  { %v1146_v8 = vadd.f32 1e-12, %v1144_v41 }
 0xe67   :  { %v1143_v4 = vpop.xlane.xlu0 %1142 }
 0xe68   :  { %3701 = vrsqrt.f32 %v1146_v8  ;;  %v1145_v9 = vmul.f32 0.03125, %v1143_v4 }
 0xe6a   :  { %v1147_v10 = vadd.f32 1e-12, %v1145_v9 }
 0xe6c   :  { %3703 = vrsqrt.f32 %v1147_v10 }
 0xe72   :  { %v3702_v16 = vpop.eup %3701 }
 0xe73   :  { %v1150_v17 = vmul.f32 %v3702_v16, %v1134_v0 }
 0xe75   :  { %v1156_v19 = vmul.f32 %v1155_v13, %v1150_v17 }
 0xe76   :  { %v3704_v20 = vpop.eup %3703 }
 0xe77   :  { %v1151_v5 = vmul.f32 %v3704_v20, %v1135_v63  ;;  %v1162_v21 = vadd.f32 %v1161_v18, %v1156_v19  ;;  %v4071_v19 = vld [vmem:[%s4297_s3 + $0x18] sm:$0xff]  }
 0xe79   :  { %v1157_v22 = vmul.f32 %v1155_v13, %v1151_v5  ;;  %3241 = vmatprep.mubr.msk.f32.mxu1 %vm34_vm0, %v1162_v21 }
 0xe7b   :  { %v1163_v14 = vadd.f32 %v1161_v18, %v1157_v22  ;;  %v4065_v18 = vld [vmem:[%s4297_s3 + $0x10] sm:$0xff]  }
 0xe7c   :  { %3463 = vmatprep.subr.bf16.mxu1 %v4065_v18 }
 0xe7d   :  { %3242 = vmatmul.mubr.msk.f32.vlgmr.msra.gmra.mrb[10].mxu1 %vm34_vm0, %v1163_v14 }
 0xe7e   :  { %3465 = vmatpush3.bf16.msra.mxu1 %v4065_v18 }
 0xe7f   :  { %3467 = vmatprep.subr.bf16.mxu1 %v4071_v19 }
 0xe82   :  { %3469 = vmatpush3.bf16.msra.mxu1 %v4071_v19 }
 0xf50   :  { %v3243_v38 = vpop.f32.mrb[10].mxu1 }
 0xf51   :  { %v1254_v28 = vadd.f32 %v3243_v38, %v1175_v27  ;;  %v1248_v30 = vpop.f32.mrb[11].mxu1 }
 0xf52   :  { %v1249_v32 = vadd.f32 %v1248_v30, %v1175_v27 }
 0xf53   :  { %v1260_v36 = vmul.f32 0.044715, %v1254_v28  ;;  %v1258_v57 = vmul.f32 0.5, %v1254_v28 }
 0xf54   :  { %v1259_v37 = vmul.f32 0.044715, %v1249_v32  ;;  %v1257_v55 = vmul.f32 0.5, %v1249_v32 }
 0xf55   :  { %v1262_v39 = vmul.f32 %v1260_v36, %v1254_v28 }
 0xf56   :  { %v1261_v42 = vmul.f32 %v1259_v37, %v1249_v32 }
 0xf57   :  { %v1264_v15 = vmul.f32 %v1262_v39, %v1254_v28 }
 0xf58   :  { %v1263_v43 = vmul.f32 %v1261_v42, %v1249_v32 }
 0xf59   :  { %v1266_v44 = vadd.f32 %v1264_v15, %v1254_v28  ;;  %v4095_v15 = vld [vmem:[%s4299_s6 + $0x8] sm:$0xff] }
 0xf5a   :  { %v1265_v46 = vadd.f32 %v1263_v43, %v1249_v32  ;;  %v1414_v32 = vrot.slane %v3867_v35, %v1413_v25  ;;  %v1431_v35 = vrot.slane %v4095_v15, %v87_v34 }
 0xf5b   :  { %v1268_v48 = vmul.f32 0.7978846, %v1266_v44 }
 0xf5c   :  { %v1267_v50 = vmul.f32 0.7978846, %v1265_v46 }
 0xf5d   :  { %3705 = vtanh.f32 %v1268_v48 }
 0xf5e   :  { %3707 = vtanh.f32 %v1267_v50 }
 0xf67   :  { %v3706_v51 = vpop.eup %3705 }
 0xf68   :  { %v3708_v53 = vpop.eup %3707  ;;  %v1272_v54 = vadd.f32 1.0, %v3706_v51 }
 0xf69   :  { %v1271_v56 = vadd.f32 1.0, %v3708_v53 }
 0xf6a   :  { %v1274_v59 = vmul.f32 %v1272_v54, %v1258_v57 }
 0xf6b   :  { %v1273_v58 = vmul.f32 %v1271_v56, %v1257_v55 }
 0xf6d   :  { %3260 = vmatprep.mubr.msk.f32.mxu0 %vm1295_vm7, %v1273_v58 }
 0xf6e   :  { %3261 = vmatmul.mubr.msk.f32.vlgmr.msra.gmra.mrb[10].mxu0 %vm1295_vm7, %v1274_v59 }
0x1041   :  { %v3262_v62 = vpop.f32.mrb[10].mxu0 }
0x1042   :  { %v1374_v63 = vadd.f32 %v3262_v62, %v1294_v61  ;;  %v1368_v0 = vpop.f32.mrb[11].mxu0 }
0x1043   :  { %v1369_v1 = vadd.f32 %v1368_v0, %v1294_v61 }
0x1044   :  { %v1378_v2 = vadd.f32 %v1374_v63, %v1163_v14 }
0x1045   :  { %v1377_v3 = vadd.f32 %v1369_v1, %v1162_v21 }
0x1046   :  { %v1382_v31 = vsel %vm34_vm0, %v1378_v2, 0.0 }
0x1047   :  { %1383 = vadd.xlane.f32.xlu1 %v1382_v31  ;;  %v1379_v29 = vsel %vm34_vm0, %v1377_v3, 0.0 }
0x1048   :  { %1380 = vadd.xlane.f32.xlu0 %v1379_v29 }
0x10d4   :  { %v1384_v6 = vpop.xlane.xlu1 %1383 }
0x10d5   :  { %v1386_v7 = vmul.f32 0.03125, %v1384_v6  ;;  %v1381_v41 = vpop.xlane.xlu0 %1380 }
0x10d6   :  { %v1385_v8 = vmul.f32 0.03125, %v1381_v41 }
0x10d7   :  { %v1388_v4 = vsub.f32 %v1378_v2, %v1386_v7 }
0x10d8   :  { %v1387_v9 = vsub.f32 %v1377_v3, %v1385_v8 }
0x10d9   :  { %v1390_v10 = vmul.f32 %v1388_v4, %v1388_v4 }
0x10da   :  { %v1389_v13 = vmul.f32 %v1387_v9, %v1387_v9 }
0x10db   :  { %v1394_v16 = vsel %vm34_vm0, %v1390_v10, 0.0 }
0x10dc   :  { %1395 = vadd.xlane.f32.xlu1 %v1394_v16  ;;  %v1391_v17 = vsel %vm34_vm0, %v1389_v13, 0.0 }
0x10dd   :  { %1392 = vadd.xlane.f32.xlu0 %v1391_v17 }
0x1169   :  { %v1396_v20 = vpop.xlane.xlu1 %1395 }
0x116a   :  { %v1398_v5 = vmul.f32 0.03125, %v1396_v20  ;;  %v1393_v21 = vpop.xlane.xlu0 %1392 }
0x116b   :  { %v1397_v22 = vmul.f32 0.03125, %v1393_v21 }
0x116c   :  { %v1400_v14 = vadd.f32 1e-12, %v1398_v5 }
0x116d   :  { %v1399_v23 = vadd.f32 1e-12, %v1397_v22 }
0x116e   :  { %3709 = vrsqrt.f32 %v1400_v14 }
0x116f   :  { %3711 = vrsqrt.f32 %v1399_v23 }
0x1178   :  { %v3710_v27 = vpop.eup %3709 }
0x1179   :  { %v3712_v38 = vpop.eup %3711  ;;  %v1404_v28 = vmul.f32 %v3710_v27, %v1388_v4 }
0x117a   :  { %v1403_v30 = vmul.f32 %v3712_v38, %v1387_v9 }
0x117b   :  { %v1410_v36 = vmul.f32 %v1408_v26, %v1404_v28 }
0x117c   :  { %v1409_v37 = vmul.f32 %v1408_v26, %v1403_v30 }
0x117d   :  { %v4086_v42 = vadd.f32 %v1414_v32, %v1410_v36 }
0x117e   :  { %v4084_v39 = vadd.f32 %v1414_v32, %v1409_v37 }
0x1180   :  { %3271 = vmatprep.mubr.msk.f32.mxu1 %vm34_vm0, %v4084_v39 }
0x1181   :  { %3272 = vmatmul.mubr.msk.f32.vlgmr.msra.gmra.mrb[12].mxu1 %vm34_vm0, %v4086_v42 }
0x1254   :  { %v3273_v43 = vpop.f32.mrb[12].mxu1 }
0x1255   :  { %v4100_v44 = vadd.f32 %v3273_v43, %v1431_v35  ;;  %v1504_v46 = vpop.f32.mrb[13].mxu1 }
0x1256   :  { %v4102_v48 = vadd.f32 %v1504_v46, %v1431_v35 }
0x1258   :  { %3278 = vmatprep.mubr.msk.f32.mxu1 %vm176_vm1, %v4102_v48  ;;  %v4108_v50 = vpack.i.bf16 %v4100_v44, %v4102_v48 }
0x125a   :  { %3621 = vrot.lane.b32.xlu1 %v4108_v50, %s3764_s19  ;;  %3616 = vrot.lane.b32.xlu0 %v4108_v50, %s3763_s18 }
0x125e   :  { %1717 = vrot.lane.b32.xlu1 %v4102_v48, %s3765_s20 }
0x1262   :  { %1719 = vrot.lane.b32.xlu1 %v4100_v44, %s3765_s20 }
0x12cc   :  { %v3622_v34 = vpop.permute.xlu1 %3621  ;;  %v3617_v51 = vpop.permute.xlu0 %3616 }
0x12cd   :  { %v3624_v53 = vunpack.i.h.bf16 %v3622_v34  ;;  %v3623_v54 = vunpack.i.l.bf16 %v3622_v34  ;;  %v3619_v55 = vunpack.i.h.bf16 %v3617_v51  ;;  %v3618_v56 = vunpack.i.l.bf16 %v3617_v51 }
0x12cf   :  { %v3470_v57 = vpack.c.bf16 %v3619_v55, %v3618_v56  ;;  %v3480_v58 = vpack.c.bf16 %v3624_v53, %v3623_v54 }
0x12d0   :  { %v1718_v59 = vpop.permute.xlu1 %1717 }
0x12d1   :  { %3472 = vmatprep.subr.msk.bf16.mxu1 %vm3892_vm2, %v3470_v57 }
0x12d2   :  { %3475 = vmatpush3.bf16.xpose.msk.msra.mxu1 %vm3892_vm2, %v3470_v57 }
0x12d3   :  { %3482 = vmatprep.subr.msk.bf16.mxu1 %vm3892_vm2, %v3480_v58 }
0x12d4   :  { %v1720_v61 = vpop.permute.xlu1 %1719 }
0x12d9   :  { %3279 = vmatmul.mubr.msk.f32.vlgmr.msra.gmra.mrb[14].mxu1 %vm176_vm1, %v4100_v44 }
0x12da   :  { %3485 = vmatpush3.bf16.xpose.msk.msra.mxu1 %vm3892_vm2, %v3480_v58  ;;  %3292 = vmatprep.mubr.msk.f32.mxu1 %vm176_vm1, %v1718_v59 }
0x12e1   :  { %3293 = vmatmul.mubr.msk.f32.vlgmr.msra.gmra.mrb[16].mxu1 %vm176_vm1, %v1720_v61 }
0x13ac   :  { %v3280_v62 = vpop.f32.mrb[14].mxu1 }
0x13ad   :  { %v1603_v63 = vmul.f32 0.35355338, %v3280_v62  ;;  %v1593_v0 = vpop.f32.mrb[15].mxu1 }
0x13ae   :  { %v1602_v1 = vmul.f32 0.35355338, %v1593_v0 }
0x13af   :  { %v1605_v2 = vadd.f32 %v1603_v63, %v3910_v52 }
0x13b0   :  { %v1604_v3 = vadd.f32 %v1602_v1, %v3905_v49 }
0x13b1   :  { %v1609_v31 = vsel %vm264_vm3, %v1605_v2, -inf }
0x13b2   :  { %1610 = vmax.xlane.f32.xlu1 %v1609_v31  ;;  %v1606_v29 = vsel %vm264_vm3, %v1604_v3, -inf }
0x13b3   :  { %1607 = vmax.xlane.f32.xlu0 %v1606_v29 }
0x13b4   :  { %v3294_v6 = vpop.f32.mrb[16].mxu1 }
0x13b5   :  { %v1799_v7 = vpop.f32.mrb[17].mxu1  ;;  %v1809_v41 = vmul.f32 0.35355338, %v3294_v6 }
0x13b6   :  { %v1808_v8 = vmul.f32 0.35355338, %v1799_v7 }
0x13b7   :  { %v1811_v10 = vadd.f32 %v1809_v41, %v3910_v52 }
0x13b8   :  { %v1810_v4 = vadd.f32 %v1808_v8, %v3905_v49 }
0x13b9   :  { %v1815_v13 = vsel %vm264_vm3, %v1811_v10, -inf }
0x13ba   :  { %v1812_v9 = vsel %vm264_vm3, %v1810_v4, -inf }
0x13bb   :  { %1813 = vmax.xlane.f32.xlu0 %v1812_v9 }
0x13bf   :  { %1816 = vmax.xlane.f32.xlu0 %v1815_v13 }
0x143f   :  { %v1611_v16 = vpop.xlane.xlu1 %1610 }
0x1440   :  { %v1613_v17 = vsub.f32 %v1605_v2, %v1611_v16  ;;  %v1608_v20 = vpop.xlane.xlu0 %1607 }
0x1441   :  { %v1612_v5 = vsub.f32 %v1604_v3, %v1608_v20 }
0x1442   :  { %v1616_v21 = vmul.f32 1.442695, %v1613_v17 }
0x1443   :  { %v1614_v22 = vmul.f32 1.442695, %v1612_v5 }
0x1444   :  { %3713 = vpow2.f32 %v1616_v21 }
0x1445   :  { %3715 = vpow2.f32 %v1614_v22 }
0x1448   :  { %v1814_v14 = vpop.xlane.xlu0 %1813 }
0x1449   :  { %v1818_v23 = vsub.f32 %v1810_v4, %v1814_v14 }
0x144b   :  { %v1820_v26 = vmul.f32 1.442695, %v1818_v23  ;;  %v3761_v23 = vld [vmem:[%s4300_s1 + $0x8] sm:$0xff] }
0x144c   :  { %v1817_v49 = vpop.xlane.xlu0 %1816 }
0x144d   :  { %3717 = vpow2.f32 %v1820_v26  ;;  %v1819_v27 = vsub.f32 %v1811_v10, %v1817_v49  ;;  %v3762_v49 = vld [vmem:[%s4300_s1] sm:$0xff] }
0x144e   :  { %v3714_v38 = vpop.eup %3713 }
0x144f   :  { %v3716_v52 = vpop.eup %3715  ;;  %v1822_v28 = vmul.f32 1.442695, %v1819_v27  ;;  %v1621_v30 = vsel %vm264_vm3, %v3714_v38, 0.0 }
0x1450   :  { %1622 = vadd.xlane.f32.xlu1 %v1621_v30  ;;  %v1618_v32 = vsel %vm264_vm3, %v3716_v52, 0.0 }
0x1451   :  { %3719 = vpow2.f32 %v1822_v28  ;;  %1619 = vadd.xlane.f32.xlu0 %v1618_v32 }
0x1457   :  { %v3718_v36 = vpop.eup %3717 }
0x1458   :  { %v1824_v37 = vsel %vm264_vm3, %v3718_v36, 0.0 }
0x1459   :  { %1825 = vadd.xlane.f32.xlu0 %v1824_v37 }
0x145b   :  { %v3720_v35 = vpop.eup %3719 }
0x145c   :  { %v1827_v43 = vsel %vm264_vm3, %v3720_v35, 0.0 }
0x145d   :  { %1828 = vadd.xlane.f32.xlu1 %v1827_v43 }
0x146e   :  { %3631 = vrot.lane.b32.xlu1 %v4108_v50, %s3767_s26 }
0x146f   :  { %3626 = vrot.lane.b32.xlu0 %v4108_v50, %s3766_s25 }
0x1472   :  { %3636 = vrot.lane.b32.xlu1 %v4108_v50, %s3769_s28 }
0x1473   :  { %1933 = vrot.lane.b32.xlu0 %v4100_v44, %s3768_s27 }
0x1476   :  { %1931 = vrot.lane.b32.xlu1 %v4102_v48, %s3768_s27 }
0x14dd   :  { %v1623_v34 = vpop.xlane.xlu1 %1622 }
0x14de   :  { %v1620_v46 = vpop.xlane.xlu0 %1619 }
0x14df   :  { %3721 = vrcp.f32 %v1620_v46 }
0x14e0   :  { %3723 = vrcp.f32 %v1623_v34 }
0x14e6   :  { %v1826_v51 = vpop.xlane.xlu0 %1825 }
0x14e7   :  { %3725 = vrcp.f32 %v1826_v51 }
0x14e9   :  { %v3722_v53 = vpop.eup %3721 }
0x14ea   :  { %v1829_v54 = vpop.xlane.xlu1 %1828  ;;  %v3627_v55 = vpop.permute.xlu0 %3626  ;;  %v1626_v56 = vmul.f32 %v3722_v53, %v3716_v52 }
0x14eb   :  { %3727 = vrcp.f32 %v1829_v54  ;;  %v3629_v57 = vunpack.i.h.bf16 %v3627_v55  ;;  %v3628_v58 = vunpack.i.l.bf16 %v3627_v55  ;;  %v3724_v61 = vpop.eup %3723 }
0x14ec   :  { %3285 = vmatprep.mubr.msk.f32.mxu0 %vm264_vm3, %v1626_v56  ;;  %v1627_v2 = vmul.f32 %v3724_v61, %v3714_v38 }
0x14ed   :  { %v3476_v59 = vpack.c.bf16 %v3629_v57, %v3628_v58 }
0x14ee   :  { %v3632_v62 = vpop.permute.xlu1 %3631  ;;  %v1934_v10 = vpop.permute.xlu0 %1933 }
0x14ef   :  { %v3634_v63 = vunpack.i.h.bf16 %v3632_v62  ;;  %v3633_v0 = vunpack.i.l.bf16 %v3632_v62  ;;  %3477 = vmatprep.subr.bf16.mxu0 %v3476_v59 }
0x14f0   :  { %3479 = vmatpush3.bf16.msra.mxu0 %v3476_v59 }
0x14f1   :  { %v3726_v1 = vpop.eup %3725  ;;  %v3486_v3 = vpack.c.bf16 %v3634_v63, %v3633_v0 }
0x14f2   :  { %v3637_v31 = vpop.permute.xlu1 %3636  ;;  %v1832_v29 = vmul.f32 %v3726_v1, %v3718_v36 }
0x14f3   :  { %v3639_v6 = vunpack.i.h.bf16 %v3637_v31  ;;  %v3638_v7 = vunpack.i.l.bf16 %v3637_v31  ;;  %3286 = vmatmul.mubr.msk.f32.vlgmr.msra.gmra.mrb[12].mxu0 %vm264_vm3, %v1627_v2  ;;  %3487 = vmatprep.subr.bf16.mxu0 %v3486_v3 }
0x14f4   :  { %3489 = vmatpush3.bf16.msra.mxu0 %v3486_v3  ;;  %3299 = vmatprep.mubr.msk.f32.mxu0 %vm264_vm3, %v1832_v29 }
0x14f5   :  { %v3728_v41 = vpop.eup %3727  ;;  %v3490_v8 = vpack.c.bf16 %v3639_v6, %v3638_v7 }
0x14f6   :  { %v1833_v4 = vmul.f32 %v3728_v41, %v3720_v35  ;;  %v1932_v9 = vpop.permute.xlu1 %1931 }
0x14f7   :  { %3492 = vmatprep.subr.msk.bf16.mxu0 %vm3892_vm2, %v3490_v8 }
0x14f8   :  { %3300 = vmatmul.mubr.msk.f32.vlgmr.msra.gmra.mrb[14].mxu0 %vm264_vm3, %v1833_v4 }
0x14f9   :  { %3306 = vmatprep.mubr.msk.f32.mxu0 %vm176_vm1, %v1932_v9 }
0x14fd   :  { %3495 = vmatpush3.bf16.xpose.msk.msra.mxu0 %vm3892_vm2, %v3490_v8 }
0x1504   :  { %3307 = vmatmul.mubr.msk.f32.vlgmr.msra.gmra.mrb[16].mxu0 %vm176_vm1, %v1934_v10 }
0x15c6   :  { %v3287_v13 = vpop.f32.mrb[12].mxu0 }
0x15c7   :  { %1716 = vst.msk [vmem:[#allocation2 + $0x8] sm:$0xff] %vm176_vm1, %v3287_v13  ;;  %v1706_v16 = vpop.f32.mrb[13].mxu0 }
0x15c8   :  { %1715 = vst.msk [vmem:[#allocation2] sm:$0xff] %vm176_vm1, %v1706_v16 }
0x15cb   :  { %v4164_v17 = vpop.f32.mrb[14].mxu0 }
0x15cc   :  { %v4166_v20 = vpop.f32.mrb[15].mxu0 }
0x15d7   :  { %v3308_v5 = vpop.f32.mrb[16].mxu0 }
0x15d8   :  { %v2023_v21 = vmul.f32 0.35355338, %v3308_v5  ;;  %v2013_v22 = vpop.f32.mrb[17].mxu0 }
0x15d9   :  { %v2022_v14 = vmul.f32 0.35355338, %v2013_v22 }
0x15da   :  { %v2025_v26 = vadd.f32 %v3761_v23, %v2023_v21 }
0x15db   :  { %v2024_v27 = vadd.f32 %v3762_v49, %v2022_v14 }
0x15dc   :  { %v2029_v38 = vsel %vm264_vm3, %v2025_v26, -inf }
0x15dd   :  { %2030 = vmax.xlane.f32.xlu0 %v2029_v38  ;;  %v2026_v52 = vsel %vm264_vm3, %v2024_v27, -inf }
0x15de   :  { %2027 = vmax.xlane.f32.xlu1 %v2026_v52 }
0x15ef   :  { %3641 = vrot.lane.b32.xlu1 %v4108_v50, %s3770_s29 }
0x15f3   :  { %2145 = vrot.lane.b32.xlu1 %v4102_v48, %s3771_s30 }
0x15f7   :  { %2147 = vrot.lane.b32.xlu1 %v4100_v44, %s3771_s30 }
0x166a   :  { %v2031_v28 = vpop.xlane.xlu0 %2030 }
0x166b   :  { %v2033_v30 = vsub.f32 %v2025_v26, %v2031_v28  ;;  %v2028_v32 = vpop.xlane.xlu1 %2027 }
0x166c   :  { %v2032_v36 = vsub.f32 %v2024_v27, %v2028_v32  ;;  %v2978_v32 = vunpack.c.h.bf16 %v4065_v18 }
0x166d   :  { %v2036_v37 = vmul.f32 1.442695, %v2033_v30  ;;  %v2977_v30 = vunpack.c.l.bf16 %v4065_v18 }
0x166e   :  { %v2034_v35 = vmul.f32 1.442695, %v2032_v36 }
0x166f   :  { %3729 = vpow2.f32 %v2036_v37  ;;  %v3642_v43 = vpop.permute.xlu1 %3641  ;;  %v3655_v36 = vpack.i.bf16 %v2978_v32, %v2977_v30  ;;  %v2493_v30 = vrot.slane %v4095_v15, %v1154_v11  ;;  %v3024_v11 = vld [vmem:[%s4302_s5 + $0x20] sm:$0xff]  }
0x1670   :  { %v3644_v46 = vunpack.i.h.bf16 %v3642_v43  ;;  %v3643_v34 = vunpack.i.l.bf16 %v3642_v43  ;;  %3731 = vpow2.f32 %v2034_v35 }
0x1672   :  { %v3496_v51 = vpack.c.bf16 %v3644_v46, %v3643_v34 }
0x1673   :  { %v2146_v2 = vpop.permute.xlu1 %2145 }
0x1674   :  { %3497 = vmatprep.subr.bf16.mxu1 %v3496_v51 }
0x1675   :  { %3499 = vmatpush3.bf16.msra.mxu1 %v3496_v51 }
0x1677   :  { %v2148_v3 = vpop.permute.xlu1 %2147 }
0x1679   :  { %v3730_v53 = vpop.eup %3729 }
0x167a   :  { %v2041_v48 = vsel %vm264_vm3, %v3730_v53, 0.0  ;;  %v3732_v54 = vpop.eup %3731 }
0x167b   :  { %2042 = vadd.xlane.f32.xlu0 %v2041_v48  ;;  %v2038_v44 = vsel %vm264_vm3, %v3732_v54, 0.0 }
0x167f   :  { %2039 = vadd.xlane.f32.xlu0 %v2038_v44 }
0x1695   :  { %3646 = vrot.lane.b32.xlu0 %v4108_v50, %s3772_s0 }
0x1708   :  { %v2043_v55 = vpop.xlane.xlu0 %2042 }
0x1709   :  { %3733 = vrcp.f32 %v2043_v55 }
0x170c   :  { %v2040_v56 = vpop.xlane.xlu0 %2039 }
0x170d   :  { %3735 = vrcp.f32 %v2040_v56  ;;  %v2981_v56 = vunpack.c.l.bf16 %v4071_v19 }
0x1710   :  { %v3647_v57 = vpop.permute.xlu0 %3646 }
0x1711   :  { %v3649_v58 = vunpack.i.h.bf16 %v3647_v57  ;;  %v3648_v59 = vunpack.i.l.bf16 %v3647_v57  ;;  %v2982_v57 = vunpack.c.h.bf16 %v4071_v19 }
0x1713   :  { %v3500_v61 = vpack.c.bf16 %v3649_v58, %v3648_v59  ;;  %v3734_v62 = vpop.eup %3733 }
0x1714   :  { %v2047_v1 = vmul.f32 %v3734_v62, %v3730_v53 }
0x1715   :  { %3502 = vmatprep.subr.msk.bf16.mxu1 %vm3892_vm2, %v3500_v61 }
0x1717   :  { %v3736_v63 = vpop.eup %3735 }
0x1718   :  { %v2046_v0 = vmul.f32 %v3736_v63, %v3732_v54 }
0x171a   :  { %3313 = vmatprep.mubr.msk.f32.mxu1 %vm264_vm3, %v2046_v0 }
0x171b   :  { %3314 = vmatmul.mubr.msk.f32.vlgmr.msra.gmra.mrb[18].mxu1 %vm264_vm3, %v2047_v1 }
0x171c   :  { %3505 = vmatpush3.bf16.xpose.msk.msra.mxu1 %vm3892_vm2, %v3500_v61  ;;  %3320 = vmatprep.mubr.msk.f32.mxu1 %vm176_vm1, %v2146_v2  ;;  %v3660_v61 = vpack.i.bf16 %v2982_v57, %v2981_v56 }
0x1723   :  { %3321 = vmatmul.mubr.msk.f32.vlgmr.msra.gmra.mrb[20].mxu1 %vm176_vm1, %v2148_v3 }
0x17ee   :  { %v3315_v31 = vpop.f32.mrb[18].mxu1 }
0x17ef   :  { %v2126_v29 = vpop.f32.mrb[19].mxu1 }
0x17f6   :  { %v3322_v6 = vpop.f32.mrb[20].mxu1 }
0x17f7   :  { %v2237_v7 = vmul.f32 0.35355338, %v3322_v6  ;;  %v2227_v41 = vpop.f32.mrb[21].mxu1 }
0x17f8   :  { %v2236_v8 = vmul.f32 0.35355338, %v2227_v41 }
0x17f9   :  { %v2239_v4 = vadd.f32 %v3761_v23, %v2237_v7 }
0x17fa   :  { %v2238_v9 = vadd.f32 %v3762_v49, %v2236_v8 }
0x17fb   :  { %v2243_v10 = vsel %vm264_vm3, %v2239_v4, -inf }
0x17fc   :  { %2244 = vmax.xlane.f32.xlu0 %v2243_v10  ;;  %v2240_v13 = vsel %vm264_vm3, %v2238_v9, -inf }
0x17fd   :  { %2241 = vmax.xlane.f32.xlu1 %v2240_v13 }
0x180e   :  { %3651 = vrot.lane.b32.xlu1 %v4108_v50, %s3773_s9 }
0x1812   :  { %1925 = vrot.lane.b32.xlu1 %v4164_v17, %s3774_s10 }
0x1816   :  { %2137 = vrot.lane.b32.xlu1 %v2126_v29, %s3775_s11  ;;  %v2364_v29 = vrot.slane %v4095_v15, %v1025_v47 }
0x181a   :  { %3656 = vrot.lane.b32.xlu1 %v3655_v36, %s3776_s12 }
0x1889   :  { %v2245_v45 = vpop.xlane.xlu0 %2244 }
0x188a   :  { %v2247_v16 = vsub.f32 %v2239_v4, %v2245_v45  ;;  %v2242_v5 = vpop.xlane.xlu1 %2241 }
0x188b   :  { %v2246_v21 = vsub.f32 %v2238_v9, %v2242_v5 }
0x188c   :  { %v2250_v22 = vmul.f32 1.442695, %v2247_v16 }
0x188d   :  { %v2248_v14 = vmul.f32 1.442695, %v2246_v21 }
0x188e   :  { %v3652_v23 = vpop.permute.xlu1 %3651 }
0x188f   :  { %3737 = vpow2.f32 %v2248_v14  ;;  %v3654_v26 = vunpack.i.h.bf16 %v3652_v23  ;;  %v3653_v49 = vunpack.i.l.bf16 %v3652_v23 }
0x1890   :  { %3739 = vpow2.f32 %v2250_v22 }
0x1891   :  { %v3506_v27 = vpack.c.bf16 %v3654_v26, %v3653_v49  ;;  %v3023_v49 = vld [vmem:[%s4301_s4 + $0x18] sm:$0xff]  }
0x1892   :  { %v1926_v38 = vpop.permute.xlu1 %1925 }
0x1893   :  { %1930 = vst.msk [vmem:[#allocation2 + $0x8] sm:$0xff] %vm588_vm4, %v1926_v38  ;;  %3507 = vmatprep.subr.bf16.mxu0 %v3506_v27 }
0x1894   :  { %3509 = vmatpush3.bf16.msra.mxu0 %v3506_v27 }
0x1896   :  { %v2138_v46 = vpop.permute.xlu1 %2137 }
0x1899   :  { %v3738_v50 = vpop.eup %3737 }
0x189a   :  { %v2252_v17 = vsel %vm264_vm3, %v3738_v50, 0.0  ;;  %v3740_v52 = vpop.eup %3739  ;;  %v3657_v48 = vpop.permute.xlu1 %3656 }
0x189b   :  { %2253 = vadd.xlane.f32.xlu0 %v2252_v17  ;;  %v2255_v28 = vsel %vm264_vm3, %v3740_v52, 0.0  ;;  %v3659_v54 = vunpack.i.h.bf16 %v3657_v48  ;;  %v3658_v44 = vunpack.i.l.bf16 %v3657_v48  ;;  %v2514_v48 = vrot.slane %v4095_v15, %v1174_v40 }
0x189d   :  { %v3510_v55 = vpack.c.bf16 %v3659_v54, %v3658_v44 }
0x189f   :  { %2256 = vadd.xlane.f32.xlu0 %v2255_v28  ;;  %3511 = vmatprep.subr.bf16.mxu0 %v3510_v55 }
0x18b5   :  { %1923 = vrot.lane.b32.xlu0 %v4166_v20, %s3774_s10 }
0x18b9   :  { %2139 = vrot.lane.b32.xlu0 %v3315_v31, %s3775_s11 }
0x1928   :  { %v2254_v37 = vpop.xlane.xlu0 %2253 }
0x1929   :  { %3741 = vrcp.f32 %v2254_v37  ;;  %v2499_v37 = vrot.slane %v4095_v15, %v1160_v12  ;;  %v3026_v12 = vld [vmem:[%s4302_s5 + $0x30] sm:$0xff]  }
0x192c   :  { %v2257_v35 = vpop.xlane.xlu0 %2256 }
0x192d   :  { %3743 = vrcp.f32 %v2257_v35 }
0x1930   :  { %v1924_v43 = vpop.permute.xlu0 %1923 }
0x1931   :  { %1929 = vst.msk [vmem:[#allocation2] sm:$0xff] %vm588_vm4, %v1924_v43 }
0x1932   :  { %2143 = vst.msk [vmem:[#allocation2] sm:$0xff] %vm803_vm5, %v2138_v46 }
0x1933   :  { %v3742_v20 = vpop.eup %3741 }
0x1934   :  { %v2140_v34 = vpop.permute.xlu0 %2139  ;;  %v2260_v51 = vmul.f32 %v3742_v20, %v3738_v50 }
0x1935   :  { %2144 = vst.msk [vmem:[#allocation2 + $0x8] sm:$0xff] %vm803_vm5, %v2140_v34 }
0x1936   :  { %3327 = vmatprep.mubr.msk.f32.mxu0 %vm264_vm3, %v2260_v51 }
0x1937   :  { %v3744_v18 = vpop.eup %3743 }
0x1938   :  { %v2261_v53 = vmul.f32 %v3744_v18, %v3740_v52  ;;  %v3025_v18 = vld [vmem:[%s4302_s5 + $0x28] sm:$0xff]  }
0x193a   :  { %3328 = vmatmul.mubr.msk.f32.vlgmr.msra.gmra.mrb[18].mxu0 %vm264_vm3, %v2261_v53  ;;  %v3027_v53 = vld [vmem:[%s4302_s5 + $0x38] sm:$0xff]  }
0x193b   :  { %3513 = vmatpush3.bf16.msra.mxu0 %v3510_v55 }
0x1a0d   :  { %v3329_v58 = vpop.f32.mrb[18].mxu0 }
0x1a0e   :  { %2353 = vrot.lane.b32.xlu0 %v3329_v58, %s3777_s13  ;;  %v2340_v59 = vpop.f32.mrb[19].mxu0 }
0x1a0f   :  { %2351 = vrot.lane.b32.xlu1 %v2340_v59, %s3777_s13 }
0x1a13   :  { %3661 = vrot.lane.b32.xlu1 %v3660_v61, %s3776_s12 }
0x1a80   :  { %v2354_v62 = vpop.permute.xlu0 %2353 }
0x1a81   :  { %2358 = vst.msk [vmem:[#allocation2 + $0x8] sm:$0xff] %vm1018_vm6, %v2354_v62  ;;  %v2352_v63 = vpop.permute.xlu1 %2351 }
0x1a82   :  { %2357 = vst.msk [vmem:[#allocation2] sm:$0xff] %vm1018_vm6, %v2352_v63 }
0x1a85   :  { %v3662_v0 = vpop.permute.xlu1 %3661 }
0x1a86   :  { %v3664_v1 = vunpack.i.h.bf16 %v3662_v0  ;;  %v3663_v2 = vunpack.i.l.bf16 %v3662_v0 }
0x1a88   :  { %v3514_v3 = vpack.c.bf16 %v3664_v1, %v3663_v2  ;;  %v2360_v31 = vld [vmem:[#allocation2 + $0x8] sm:$0xff] }
0x1a89   :  { %v2359_v19 = vld [vmem:[#allocation2] sm:$0xff] }
0x1a8a   :  { %3515 = vmatprep.subr.bf16.mxu0 %v3514_v3  ;;  %3338 = vmatprep.mubr.msk.f32.mxu0 %vm34_vm0, %v2359_v19 }
0x1a8b   :  { %3517 = vmatpush3.bf16.msra.mxu0 %v3514_v3 }
0x1a8c   :  { %3527 = vmatprep.subr.bf16.mxu0 %v3024_v11 }
0x1a8e   :  { %3339 = vmatmul.mubr.msk.f32.vlgmr.msra.gmra.mrb[20].mxu0 %vm34_vm0, %v2360_v31 }
0x1a8f   :  { %3529 = vmatpush3.bf16.msra.mxu0 %v3024_v11 }
0x1a90   :  { %3531 = vmatprep.subr.bf16.mxu0 %v3025_v18 }
0x1a93   :  { %3533 = vmatpush3.bf16.msra.mxu0 %v3025_v18 }
0x1a94   :  { %3535 = vmatprep.subr.bf16.mxu0 %v3026_v12 }
0x1a97   :  { %3537 = vmatpush3.bf16.msra.mxu0 %v3026_v12 }
0x1a98   :  { %3539 = vmatprep.subr.bf16.mxu0 %v3027_v53 }
0x1a9b   :  { %3541 = vmatpush3.bf16.msra.mxu0 %v3027_v53 }
0x1b61   :  { %v3340_v6 = vpop.f32.mrb[20].mxu0 }
0x1b62   :  { %v2459_v7 = vadd.f32 %v3340_v6, %v2364_v29  ;;  %v2453_v41 = vpop.f32.mrb[21].mxu0 }
0x1b63   :  { %v2454_v8 = vadd.f32 %v2453_v41, %v2364_v29 }
0x1b64   :  { %v2463_v4 = vadd.f32 %v2459_v7, %v4086_v42 }
0x1b65   :  { %v2462_v9 = vadd.f32 %v2454_v8, %v4084_v39  ;;  %v3022_v39 = vld [vmem:[%s4301_s4 + $0x10] sm:$0xff]  }
0x1b66   :  { %v2467_v10 = vsel %vm34_vm0, %v2463_v4, 0.0  ;;  %3519 = vmatprep.subr.bf16.mxu1 %v3022_v39 }
0x1b67   :  { %2468 = vadd.xlane.f32.xlu1 %v2467_v10  ;;  %v2464_v13 = vsel %vm34_vm0, %v2462_v9, 0.0  ;;  %3521 = vmatpush3.bf16.msra.mxu1 %v3022_v39 }
0x1b68   :  { %2465 = vadd.xlane.f32.xlu0 %v2464_v13  ;;  %3523 = vmatprep.subr.bf16.mxu1 %v3023_v49 }
0x1b6b   :  { %3525 = vmatpush3.bf16.msra.mxu1 %v3023_v49 }
0x1bf4   :  { %v2469_v45 = vpop.xlane.xlu1 %2468 }
0x1bf5   :  { %v2471_v16 = vmul.f32 0.03125, %v2469_v45  ;;  %v2466_v5 = vpop.xlane.xlu0 %2465 }
0x1bf6   :  { %v2470_v21 = vmul.f32 0.03125, %v2466_v5 }
0x1bf7   :  { %v2473_v22 = vsub.f32 %v2463_v4, %v2471_v16  ;;  %v2634_v4 = vrot.slane %v4095_v15, %v1293_v60 }
0x1bf8   :  { %v2472_v47 = vsub.f32 %v2462_v9, %v2470_v21 }
0x1bf9   :  { %v2475_v26 = vmul.f32 %v2473_v22, %v2473_v22 }
0x1bfa   :  { %v2474_v14 = vmul.f32 %v2472_v47, %v2472_v47 }
0x1bfb   :  { %v2479_v42 = vsel %vm34_vm0, %v2475_v26, 0.0 }
0x1bfc   :  { %v2476_v23 = vsel %vm34_vm0, %v2474_v14, 0.0 }
0x1bfd   :  { %2477 = vadd.xlane.f32.xlu0 %v2476_v23 }
0x1c01   :  { %2480 = vadd.xlane.f32.xlu0 %v2479_v42 }
0x1c8a   :  { %v2478_v27 = vpop.xlane.xlu0 %2477 }
0x1c8b   :  { %v2482_v38 = vmul.f32 0.03125, %v2478_v27 }
0x1c8d   :  { %v2484_v50 = vadd.f32 1e-12, %v2482_v38 }
0x1c8e   :  { %v2481_v17 = vpop.xlane.xlu0 %2480 }
0x1c8f   :  { %3745 = vrsqrt.f32 %v2484_v50  ;;  %v2483_v52 = vmul.f32 0.03125, %v2481_v17  ;;  %v3008_v50 = vld [vmem:[%s4303_s7] sm:$0xff]   ;;  %v3028_v17 = vld [vmem:[%s4303_s7 + $0x8] sm:$0xff]  }
0x1c90   :  { %3543 = vmatprep.subr.bf16.mxu1 %v3008_v50 }
0x1c91   :  { %v2485_v28 = vadd.f32 1e-12, %v2483_v52 }
0x1c93   :  { %3747 = vrsqrt.f32 %v2485_v28 }
0x1c99   :  { %v3746_v32 = vpop.eup %3745 }
0x1c9a   :  { %v2488_v36 = vmul.f32 %v3746_v32, %v2472_v47 }
0x1c9c   :  { %v2494_v35 = vmul.f32 %v2493_v30, %v2488_v36 }
0x1c9d   :  { %v3748_v43 = vpop.eup %3747 }
0x1c9e   :  { %v2489_v46 = vmul.f32 %v3748_v43, %v2473_v22  ;;  %v2500_v20 = vadd.f32 %v2499_v37, %v2494_v35  ;;  %v2747_v35 = vrot.slane %v4095_v15, %v1407_v24  ;;  %v2940_v24 = vld [vmem:[%s4298_s2 + $0x2] ss:$0 sm:$0xff] }
0x1ca0   :  { %v2495_v34 = vmul.f32 %v2493_v30, %v2489_v46  ;;  %3349 = vmatprep.mubr.msk.f32.mxu1 %vm34_vm0, %v2500_v20 }
0x1ca2   :  { %v2501_v51 = vadd.f32 %v2499_v37, %v2495_v34 }
0x1ca4   :  { %3350 = vmatmul.mubr.msk.f32.vlgmr.msra.gmra.mrb[22].mxu1 %vm34_vm0, %v2501_v51 }
0x1ca5   :  { %3545 = vmatpush3.bf16.msra.mxu1 %v3008_v50 }
0x1ca6   :  { %3547 = vmatprep.subr.bf16.mxu1 %v3028_v17 }
0x1ca9   :  { %3549 = vmatpush3.bf16.msra.mxu1 %v3028_v17 }
0x1d77   :  { %v3351_v54 = vpop.f32.mrb[22].mxu1 }
0x1d78   :  { %v2593_v44 = vadd.f32 %v3351_v54, %v2514_v48  ;;  %v2587_v55 = vpop.f32.mrb[23].mxu1 }
0x1d79   :  { %v2588_v56 = vadd.f32 %v2587_v55, %v2514_v48 }
0x1d7a   :  { %v2599_v57 = vmul.f32 0.044715, %v2593_v44  ;;  %v2597_v7 = vmul.f32 0.5, %v2593_v44 }
0x1d7b   :  { %v2598_v58 = vmul.f32 0.044715, %v2588_v56  ;;  %v2596_v40 = vmul.f32 0.5, %v2588_v56 }
0x1d7c   :  { %v2601_v59 = vmul.f32 %v2599_v57, %v2593_v44 }
0x1d7d   :  { %v2600_v61 = vmul.f32 %v2598_v58, %v2588_v56 }
0x1d7e   :  { %v2603_v62 = vmul.f32 %v2601_v59, %v2593_v44 }
0x1d7f   :  { %v2602_v63 = vmul.f32 %v2600_v61, %v2588_v56 }
0x1d80   :  { %v2605_v0 = vadd.f32 %v2603_v62, %v2593_v44 }
0x1d81   :  { %v2604_v1 = vadd.f32 %v2602_v63, %v2588_v56 }
0x1d82   :  { %v2607_v2 = vmul.f32 0.7978846, %v2605_v0 }
0x1d83   :  { %v2606_v3 = vmul.f32 0.7978846, %v2604_v1 }
0x1d84   :  { %3749 = vtanh.f32 %v2607_v2 }
0x1d85   :  { %3751 = vtanh.f32 %v2606_v3 }
0x1d8e   :  { %v3750_v19 = vpop.eup %3749 }
0x1d8f   :  { %v3752_v31 = vpop.eup %3751  ;;  %v2611_v29 = vadd.f32 1.0, %v3750_v19 }
0x1d90   :  { %v2610_v6 = vadd.f32 1.0, %v3752_v31 }
0x1d91   :  { %v2613_v8 = vmul.f32 %v2611_v29, %v2597_v7 }
0x1d92   :  { %v2612_v41 = vmul.f32 %v2610_v6, %v2596_v40 }
0x1d94   :  { %3368 = vmatprep.mubr.msk.f32.mxu0 %vm1295_vm7, %v2612_v41 }
0x1d95   :  { %3369 = vmatmul.mubr.msk.f32.vlgmr.msra.gmra.mrb[22].mxu0 %vm1295_vm7, %v2613_v8 }
0x1e68   :  { %v3370_v9 = vpop.f32.mrb[22].mxu0 }
0x1e69   :  { %v2713_v10 = vadd.f32 %v3370_v9, %v2634_v4  ;;  %v2707_v13 = vpop.f32.mrb[23].mxu0 }
0x1e6a   :  { %v2708_v45 = vadd.f32 %v2707_v13, %v2634_v4 }
0x1e6b   :  { %v2717_v16 = vadd.f32 %v2713_v10, %v2501_v51  ;;  %v2753_v51 = vrot.slane %v4095_v15, %v1413_v25 }
0x1e6c   :  { %v2716_v5 = vadd.f32 %v2708_v45, %v2500_v20 }
0x1e6d   :  { %v2721_v21 = vsel %vm34_vm0, %v2717_v16, 0.0 }
0x1e6e   :  { %2722 = vadd.xlane.f32.xlu1 %v2721_v21  ;;  %v2718_v22 = vsel %vm34_vm0, %v2716_v5, 0.0 }
0x1e6f   :  { %2719 = vadd.xlane.f32.xlu0 %v2718_v22 }
0x1efb   :  { %v2723_v47 = vpop.xlane.xlu1 %2722 }
0x1efc   :  { %v2725_v14 = vmul.f32 0.03125, %v2723_v47  ;;  %v2720_v23 = vpop.xlane.xlu0 %2719 }
0x1efd   :  { %v2724_v26 = vmul.f32 0.03125, %v2720_v23 }
0x1efe   :  { %v2727_v42 = vsub.f32 %v2717_v16, %v2725_v14 }
0x1eff   :  { %v2726_v39 = vsub.f32 %v2716_v5, %v2724_v26 }
0x1f00   :  { %v2729_v49 = vmul.f32 %v2727_v42, %v2727_v42 }
0x1f01   :  { %v2728_v60 = vmul.f32 %v2726_v39, %v2726_v39 }
0x1f02   :  { %v2733_v27 = vsel %vm34_vm0, %v2729_v49, 0.0 }
0x1f03   :  { %2734 = vadd.xlane.f32.xlu1 %v2733_v27  ;;  %v2730_v38 = vsel %vm34_vm0, %v2728_v60, 0.0 }
0x1f04   :  { %2731 = vadd.xlane.f32.xlu0 %v2730_v38 }
0x1f90   :  { %v2735_v52 = vpop.xlane.xlu1 %2734 }
0x1f91   :  { %v2737_v28 = vmul.f32 0.03125, %v2735_v52  ;;  %v2732_v30 = vpop.xlane.xlu0 %2731 }
0x1f92   :  { %v2736_v32 = vmul.f32 0.03125, %v2732_v30 }
0x1f93   :  { %v2739_v36 = vadd.f32 1e-12, %v2737_v28 }
0x1f94   :  { %v2738_v37 = vadd.f32 1e-12, %v2736_v32 }
0x1f95   :  { %3753 = vrsqrt.f32 %v2739_v36 }
0x1f96   :  { %3755 = vrsqrt.f32 %v2738_v37 }
0x1f9f   :  { %v3754_v43 = vpop.eup %3753 }
0x1fa0   :  { %v3756_v46 = vpop.eup %3755  ;;  %v2743_v20 = vmul.f32 %v3754_v43, %v2727_v42 }
0x1fa1   :  { %v2742_v34 = vmul.f32 %v3756_v46, %v2726_v39 }
0x1fa2   :  { %v2749_v11 = vmul.f32 %v2747_v35, %v2743_v20 }
0x1fa3   :  { %v2748_v18 = vmul.f32 %v2747_v35, %v2742_v34 }
0x1fa4   :  { %v2755_v53 = vadd.f32 %v2753_v51, %v2749_v11 }
0x1fa5   :  { %v2754_v12 = vadd.f32 %v2753_v51, %v2748_v18 }
0x1fa7   :  { %3379 = vmatprep.mubr.msk.f32.mxu1 %vm34_vm0, %v2754_v12 }
0x1fa8   :  { %3380 = vmatmul.mubr.msk.f32.vlgmr.msra.gmra.mrb[24].mxu1 %vm34_vm0, %v2755_v53 }
0x207b   :  { %v3381_v48 = vpop.f32.mrb[24].mxu1 }
0x207c   :  { %v2846_v54 = vadd.f32 %v3381_v48, %v2940_v24  ;;  %v2840_v44 = vpop.f32.mrb[25].mxu1 }
0x207d   :  { %v2841_v55 = vadd.f32 %v2940_v24, %v2840_v44 }
0x207e   :  { %3757 = vtanh.f32 %v2846_v54 }
0x207f   :  { %3759 = vtanh.f32 %v2841_v55 }
0x2088   :  { %v3758_v33 = vpop.eup %3757 }
0x2089   :  { %v3760_v25 = vpop.eup %3759  ;;  %2852 = vst.msk [vmem:[%s4304_s8 + $0x8] sm:$0xff] %vm34_vm0, %v3758_v33 }
0x208a   :  { %2851 = vst.msk [vmem:[%s4304_s8] sm:$0xff] %vm34_vm0, %v3760_v25 }

</bundles_post_ra>
